<compile_context>
chip_gen: v5e
topology: v5e:2x2
jax: 0.10.0
libtpu: 0.0.40
codegen_flags: <defaults>
</compile_context>

<pallas_src>
import functools

import jax
import jax.numpy as jnp
from jax.experimental import pallas as pl
from jax.experimental.pallas import tpu as pltpu

LAYER_DRUG = 3
DIM_DRUG = 32
IN_DIM = 77          # drug.x node-feature dim (as in the reference module)
IN_PAD = 80          # IN_DIM padded to a multiple of 8 (sublane alignment)
EMB_DIM = 256
BN_EPS = 1e-5
NEG_INF = -1e30
LANE = 128


def gnn_drug_kernel(n_real, xT_ref, adjT_ref, madd_ref, valid_ref,
                    w1t0_ref, wsq_ref, v_ref, wemb_ref, bemb_ref, out_ref):
    """Feature-major GNN_drug forward.

    xT_ref   : [IN_PAD, N_PAD]   node features, transposed, zero-padded
    adjT_ref : [N_PAD,  N_PAD]   (adj + (1+eps)*I)^T, eps=0, zero-padded
    madd_ref : [G, N_PAD]        additive pool mask: 0 member / -BIG otherwise
    valid_ref: [1, N_PAD]        1.0 real node / 0.0 padding (for BN stats)
    w1t0_ref : [32, IN_PAD]      layer-0 W1^T (77 cols zero-padded to 80)
    wsq_ref  : [160, 32]         [W2T_0; W1T_1; W2T_1; W1T_2; W2T_2]
    v_ref    : [32, 12]          columns 4i..4i+3 = b1, b2, gamma, beta (layer i)
    wemb_ref : [96, 256], bemb_ref: [1, 256]
    out_ref  : [G, 256]
    """
    X = xT_ref[...]                      # [IN_PAD, N_PAD]  feature-major
    adjT = adjT_ref[...]                 # [N_PAD, N_PAD]   self-loop folded in
    madd = madd_ref[...]                 # [G, N_PAD]
    valid = valid_ref[...]               # [1, N_PAD]
    wsq = wsq_ref[...]                   # [160, 32]
    v = v_ref[...]                       # [32, 12]

    inv_n = 1.0 / n_real
    pooled_list = []

    for i in range(LAYER_DRUG):
        # ---- weight / parameter blocks (sublane-aligned static slices) ----
        if i == 0:
            w1t = w1t0_ref[...]                          # [32, IN_PAD]
        else:
            lo = DIM_DRUG * (2 * i - 1)
            w1t = wsq[lo:lo + DIM_DRUG, :]               # [32, 32]
        lo2 = DIM_DRUG * (2 * i)
        w2t = wsq[lo2:lo2 + DIM_DRUG, :]                 # [32, 32]
        b1 = v[:, 4 * i + 0:4 * i + 1]                   # [32, 1]
        b2 = v[:, 4 * i + 1:4 * i + 2]
        gamma = v[:, 4 * i + 2:4 * i + 3]
        beta = v[:, 4 * i + 3:4 * i + 4]

        # ---- GIN aggregation: agg^T = x^T @ adj_hat^T (single MXU matmul) ----
        agg = jnp.dot(X, adjT, preferred_element_type=jnp.float32)  # [F_in, N_PAD]

        # ---- GIN MLP (transposed): Linear -> ReLU -> Linear, outer ReLU ----
        h = jnp.maximum(
            jnp.dot(w1t, agg, preferred_element_type=jnp.float32) + b1, 0.0)
        h = jnp.dot(w2t, h, preferred_element_type=jnp.float32) + b2
        h = jnp.maximum(h, 0.0)                          # [32, N_PAD], lane-dense

        # ---- BatchNorm1d (training-mode batch stats over REAL nodes only) ----
        # Single fused reduction pass over [h ; h*h]; one-pass var clamped >= 0.
        hv = h * valid
        sums = jnp.sum(jnp.concatenate([hv, hv * hv], axis=0),
                       axis=1, keepdims=True)            # [64, 1]
        mean = sums[:DIM_DRUG] * inv_n                   # [32, 1]
        mean_sq = sums[DIM_DRUG:] * inv_n
        var = jnp.maximum(mean_sq - mean * mean, 0.0)
        scale = gamma * jax.lax.rsqrt(var + BN_EPS)
        shift = beta - mean * scale
        h = h * scale + shift
        X = h

        # ---- per-layer global_max_pool, vectorized over graphs ----
        # padded / non-member columns carry -BIG via the additive mask.
        pooled = jnp.max(h[None, :, :] + madd[:, None, :], axis=2)  # [G, 32]
        pooled_list.append(pooled)

    # JumpingKnowledge 'cat' (max commutes with the per-feature concat) followed
    # by a SINGLE fused [G,96] @ [96,256] matmul for drug_emb's Linear.
    pooled_cat = jnp.concatenate(pooled_list, axis=1)                # [G, 96]
    out = jnp.dot(pooled_cat, wemb_ref[...],
                  preferred_element_type=jnp.float32) + bemb_ref[...]
    # Dropout(p=0.2) is identity in eval mode.
    # TODO(synk): no dropout RNG applied (eval-mode identity, as stated).
    out_ref[...] = jnp.maximum(out, 0.0)


def pack_inputs(x, adj, mask, params):
    """Host-side packing: transpose to feature-major, pad node axis to 128 lanes,
    fold the GIN self-loop into the adjacency, pack weights/vectors into slabs."""
    n, in_dim = x.shape
    g = mask.shape[1]
    n_pad = ((n + LANE - 1) // LANE) * LANE

    # Node features, feature-major, zero-padded to [IN_PAD, N_PAD].
    xT = jnp.zeros((IN_PAD, n_pad), jnp.float32).at[:in_dim, :n].set(x.T)

    # Adjacency with self-loop ((1+eps)*I, eps=0), transposed, zero-padded.
    adj_hat = adj + jnp.eye(n, dtype=adj.dtype)
    adjT = jnp.zeros((n_pad, n_pad), jnp.float32).at[:n, :n].set(adj_hat.T)

    # Additive max-pool mask [G, N_PAD] and BN validity mask [1, N_PAD].
    madd = jnp.full((g, n_pad), NEG_INF, jnp.float32).at[:, :n].set(
        jnp.where(mask.T > 0.5, 0.0, NEG_INF))
    valid = jnp.zeros((1, n_pad), jnp.float32).at[:, :n].set(1.0)

    # Transposed weights: layer-0 W1^T padded to [32, IN_PAD]; the five [32,32]
    # blocks stacked sublane-aligned: [W2T_0; W1T_1; W2T_1; W1T_2; W2T_2].
    w1t0 = jnp.zeros((DIM_DRUG, IN_PAD), jnp.float32).at[:, :in_dim].set(
        params[0].T)
    sq_blocks = []
    v_cols = []
    for i in range(LAYER_DRUG):
        w1, b1, w2, b2, gamma, beta = params[6 * i:6 * i + 6]
        if i > 0:
            sq_blocks.append(w1.T)
        sq_blocks.append(w2.T)
        v_cols += [b1.T, b2.T, gamma.T, beta.T]          # each [32, 1]
    wsq = jnp.concatenate(sq_blocks, axis=0)             # [160, 32]
    v_slab = jnp.concatenate(v_cols, axis=1)             # [32, 12]

    w_emb, b_emb = params[-2], params[-1]                # [96, 256], [1, 256]
    return (xT, adjT, madd, valid, w1t0, wsq, v_slab, w_emb, b_emb), n


def gnn_drug_forward(x, adj, mask, params):
    inputs, n_real = pack_inputs(x, adj, mask, params)
    num_graphs = mask.shape[1]
    kernel = functools.partial(gnn_drug_kernel, float(n_real))
    vmem = pl.BlockSpec(memory_space=pltpu.MemorySpace.VMEM)
    # TODO(synk): at large N, tile adjT into node-row blocks with a grid (node
    # axis "parallel" for v7x megacore, neighbor axis "arbitrary"), keep the
    # weight slabs / x resident via constant index_maps, cast adjT & x to bf16
    # for the aggregation matmul, and set vmem_limit_bytes explicitly; the
    # whole-graph-in-VMEM form below is only appropriate at these small sizes.
    return pl.pallas_call(
        kernel,
        out_shape=jax.ShapeDtypeStruct((num_graphs, EMB_DIM), jnp.float32),
        in_specs=[vmem] * len(inputs),
        out_specs=vmem,
    )(*inputs)


def reference_forward(x, adj, mask, params):
    """Pure-JAX reference mirroring the PyTorch forward semantics."""
    feats = []
    for i in range(LAYER_DRUG):
        w1, b1, w2, b2, gamma, beta = params[6 * i:6 * i + 6]
        agg = x + adj @ x
        h = jnp.maximum(agg @ w1 + b1, 0.0)
        h = h @ w2 + b2
        h = jnp.maximum(h, 0.0)
        mean = jnp.mean(h, axis=0, keepdims=True)
        var = jnp.mean((h - mean) ** 2, axis=0, keepdims=True)
        h = (h - mean) * jax.lax.rsqrt(var + BN_EPS) * gamma + beta
        x = h
        feats.append(h)
    node_rep = jnp.concatenate(feats, axis=-1)
    pooled = []
    for g in range(mask.shape[1]):
        m = mask[:, g:g + 1]
        pooled.append(jnp.max(jnp.where(m > 0.5, node_rep, NEG_INF), axis=0))
    pooled = jnp.stack(pooled, axis=0)
    w_emb, b_emb = params[-2], params[-1]
    return jnp.maximum(pooled @ w_emb + b_emb, 0.0)


def init_params(key):
    """Deterministic synthetic parameters (same shapes as the PyTorch module)."""
    params = []
    for i in range(LAYER_DRUG):
        fan_in = IN_DIM if i == 0 else DIM_DRUG
        key, k1, k2 = jax.random.split(key, 3)
        w1 = jax.random.normal(k1, (fan_in, DIM_DRUG), jnp.float32) / jnp.sqrt(fan_in)
        b1 = jnp.full((1, DIM_DRUG), 0.01, jnp.float32)
        w2 = jax.random.normal(k2, (DIM_DRUG, DIM_DRUG), jnp.float32) / jnp.sqrt(DIM_DRUG)
        b2 = jnp.full((1, DIM_DRUG), -0.01, jnp.float32)
        gamma = jnp.ones((1, DIM_DRUG), jnp.float32)
        beta = jnp.zeros((1, DIM_DRUG), jnp.float32)
        params += [w1, b1, w2, b2, gamma, beta]
    key, k3 = jax.random.split(key)
    w_emb = jax.random.normal(
        k3, (DIM_DRUG * LAYER_DRUG, EMB_DIM), jnp.float32) / jnp.sqrt(DIM_DRUG * LAYER_DRUG)
    b_emb = jnp.zeros((1, EMB_DIM), jnp.float32)
    params += [w_emb, b_emb]
    return params


if __name__ == "__main__":
    key = jax.random.PRNGKey(0)

    N = 32          # total nodes across the batch of graphs
    G = 2           # number of graphs
    E_PER_GRAPH = 48

    # node features
    key, kx = jax.random.split(key)
    x = jax.random.normal(kx, (N, IN_DIM), jnp.float32)

    # batch assignment: first 16 nodes -> graph 0, last 16 nodes -> graph 1
    batch = jnp.concatenate(
        [jnp.zeros(N // 2, jnp.int32), jnp.ones(N - N // 2, jnp.int32)])
    mask = (batch[:, None] == jnp.arange(G)[None, :]).astype(jnp.float32)  # [N, G]

    # random intra-graph edges -> dense adjacency with A[dst, src] += 1
    adj = jnp.zeros((N, N), jnp.float32)
    half = N // 2
    for g, (lo, hi) in enumerate([(0, half), (half, N)]):
        key, ks, kd = jax.random.split(key, 3)
        src = jax.random.randint(ks, (E_PER_GRAPH,), lo, hi)
        dst = jax.random.randint(kd, (E_PER_GRAPH,), lo, hi)
        adj = adj.at[dst, src].add(1.0)
        adj = adj.at[src, dst].add(1.0)   # undirected

    params = init_params(jax.random.PRNGKey(42))

    out = gnn_drug_forward(x, adj, mask, params)
    out = jax.block_until_ready(out)

    ref = reference_forward(x, adj, mask, params)
    assert out.shape == (G, EMB_DIM), out.shape
    assert bool(jnp.all(jnp.isfinite(out)))
    # loose tolerance: MXU default-precision matmul passes + one-pass BN variance
    assert bool(jnp.allclose(out, ref, rtol=1e-1, atol=1e-1)), float(
        jnp.max(jnp.abs(out - ref)))

    print("KERNEL_OK")
</pallas_src>

<mosaic_0001>
module attributes {stable_mosaic.version = 11 : i64} {
  func.func @gnn_drug_kernel(%arg0: memref<80x128xf32, #tpu.memory_space<vmem>>, %arg1: memref<128x128xf32, #tpu.memory_space<vmem>>, %arg2: memref<2x128xf32, #tpu.memory_space<vmem>>, %arg3: memref<1x128xf32, #tpu.memory_space<vmem>>, %arg4: memref<32x80xf32, #tpu.memory_space<vmem>>, %arg5: memref<160x32xf32, #tpu.memory_space<vmem>>, %arg6: memref<32x12xf32, #tpu.memory_space<vmem>>, %arg7: memref<96x256xf32, #tpu.memory_space<vmem>>, %arg8: memref<1x256xf32, #tpu.memory_space<vmem>>, %arg9: memref<2x256xf32, #tpu.memory_space<vmem>>) attributes {dimension_semantics = [], scalar_prefetch = 0 : i64, scratch_operands = 0 : i64, tpu.core_type = #tpu.core_type<tc>} {
    %c0 = arith.constant 0 : index
    %c0_0 = arith.constant 0 : index
    %0 = vector.load %arg0[%c0, %c0_0] : memref<80x128xf32, #tpu.memory_space<vmem>>, vector<80x128xf32>
    %c0_1 = arith.constant 0 : index
    %c0_2 = arith.constant 0 : index
    %1 = vector.load %arg1[%c0_1, %c0_2] : memref<128x128xf32, #tpu.memory_space<vmem>>, vector<128x128xf32>
    %c0_3 = arith.constant 0 : index
    %c0_4 = arith.constant 0 : index
    %2 = vector.load %arg2[%c0_3, %c0_4] : memref<2x128xf32, #tpu.memory_space<vmem>>, vector<2x128xf32>
    %c0_5 = arith.constant 0 : index
    %c0_6 = arith.constant 0 : index
    %3 = vector.load %arg3[%c0_5, %c0_6] : memref<1x128xf32, #tpu.memory_space<vmem>>, vector<1x128xf32>
    %c0_7 = arith.constant 0 : index
    %c0_8 = arith.constant 0 : index
    %4 = vector.load %arg5[%c0_7, %c0_8] : memref<160x32xf32, #tpu.memory_space<vmem>>, vector<160x32xf32>
    %c0_9 = arith.constant 0 : index
    %c0_10 = arith.constant 0 : index
    %5 = vector.load %arg6[%c0_9, %c0_10] : memref<32x12xf32, #tpu.memory_space<vmem>>, vector<32x12xf32>
    %c0_11 = arith.constant 0 : index
    %c0_12 = arith.constant 0 : index
    %6 = vector.load %arg4[%c0_11, %c0_12] : memref<32x80xf32, #tpu.memory_space<vmem>>, vector<32x80xf32>
    %7 = vector.extract_strided_slice %4 {offsets = [0, 0], sizes = [32, 32], strides = [1, 1]} : vector<160x32xf32> to vector<32x32xf32>
    %8 = vector.extract_strided_slice %5 {offsets = [0, 0], sizes = [32, 1], strides = [1, 1]} : vector<32x12xf32> to vector<32x1xf32>
    %9 = vector.extract_strided_slice %5 {offsets = [0, 1], sizes = [32, 1], strides = [1, 1]} : vector<32x12xf32> to vector<32x1xf32>
    %10 = vector.extract_strided_slice %5 {offsets = [0, 2], sizes = [32, 1], strides = [1, 1]} : vector<32x12xf32> to vector<32x1xf32>
    %11 = vector.extract_strided_slice %5 {offsets = [0, 3], sizes = [32, 1], strides = [1, 1]} : vector<32x12xf32> to vector<32x1xf32>
    %cst = arith.constant dense<0.000000e+00> : vector<80x128xf32>
    %12 = tpu.matmul %0, %1, %cst {dimension_numbers = #tpu.dot_dimension_numbers<[1], [0], [0], [1], [0, 0, 1, 1], [], []>} : vector<80x128xf32>, vector<128x128xf32>, vector<80x128xf32> -> vector<80x128xf32>
    %cst_13 = arith.constant dense<0.000000e+00> : vector<32x128xf32>
    %13 = tpu.matmul %6, %12, %cst_13 {dimension_numbers = #tpu.dot_dimension_numbers<[1], [0], [0], [1], [0, 0, 1, 1], [], []>} : vector<32x80xf32>, vector<80x128xf32>, vector<32x128xf32> -> vector<32x128xf32>
    %14 = vector.broadcast %8 : vector<32x1xf32> to vector<32x128xf32>
    %15 = arith.addf %13, %14 : vector<32x128xf32>
    %cst_14 = arith.constant 0.000000e+00 : f32
    %16 = vector.broadcast %cst_14 : f32 to vector<32x128xf32>
    %17 = arith.maximumf %15, %16 : vector<32x128xf32>
    %cst_15 = arith.constant dense<0.000000e+00> : vector<32x128xf32>
    %18 = tpu.matmul %7, %17, %cst_15 {dimension_numbers = #tpu.dot_dimension_numbers<[1], [0], [0], [1], [0, 0, 1, 1], [], []>} : vector<32x32xf32>, vector<32x128xf32>, vector<32x128xf32> -> vector<32x128xf32>
    %19 = vector.broadcast %9 : vector<32x1xf32> to vector<32x128xf32>
    %20 = arith.addf %18, %19 : vector<32x128xf32>
    %cst_16 = arith.constant 0.000000e+00 : f32
    %21 = vector.broadcast %cst_16 : f32 to vector<32x128xf32>
    %22 = arith.maximumf %20, %21 : vector<32x128xf32>
    %23 = vector.broadcast %3 : vector<1x128xf32> to vector<32x128xf32>
    %24 = arith.mulf %22, %23 : vector<32x128xf32>
    %25 = arith.mulf %24, %24 : vector<32x128xf32>
    %26 = tpu.concatenate %24, %25 in 0 : vector<32x128xf32>, vector<32x128xf32> -> vector<64x128xf32>
    %cst_17 = arith.constant dense<0.000000e+00> : vector<64xf32>
    %27 = vector.multi_reduction <add>, %26, %cst_17 [1] : vector<64x128xf32> to vector<64xf32>
    %28 = vector.shape_cast %27 : vector<64xf32> to vector<64x1xf32>
    %29 = vector.extract_strided_slice %28 {offsets = [0, 0], sizes = [32, 1], strides = [1, 1]} : vector<64x1xf32> to vector<32x1xf32>
    %cst_18 = arith.constant 3.125000e-02 : f32
    %30 = vector.broadcast %cst_18 : f32 to vector<32x1xf32>
    %31 = arith.mulf %29, %30 : vector<32x1xf32>
    %32 = vector.extract_strided_slice %28 {offsets = [32, 0], sizes = [32, 1], strides = [1, 1]} : vector<64x1xf32> to vector<32x1xf32>
    %cst_19 = arith.constant 3.125000e-02 : f32
    %33 = vector.broadcast %cst_19 : f32 to vector<32x1xf32>
    %34 = arith.mulf %32, %33 : vector<32x1xf32>
    %35 = arith.mulf %31, %31 : vector<32x1xf32>
    %36 = arith.subf %34, %35 : vector<32x1xf32>
    %cst_20 = arith.constant 0.000000e+00 : f32
    %37 = vector.broadcast %cst_20 : f32 to vector<32x1xf32>
    %38 = arith.maximumf %36, %37 : vector<32x1xf32>
    %cst_21 = arith.constant 9.99999974E-6 : f32
    %39 = vector.broadcast %cst_21 : f32 to vector<32x1xf32>
    %40 = arith.addf %38, %39 : vector<32x1xf32>
    %41 = math.rsqrt %40 : vector<32x1xf32>
    %42 = arith.mulf %10, %41 : vector<32x1xf32>
    %43 = arith.mulf %31, %42 : vector<32x1xf32>
    %44 = arith.subf %11, %43 : vector<32x1xf32>
    %45 = vector.broadcast %42 : vector<32x1xf32> to vector<32x128xf32>
    %46 = arith.mulf %22, %45 : vector<32x128xf32>
    %47 = vector.broadcast %44 : vector<32x1xf32> to vector<32x128xf32>
    %48 = arith.addf %46, %47 : vector<32x128xf32>
    %49 = vector.shape_cast %48 : vector<32x128xf32> to vector<1x32x128xf32>
    %50 = vector.shape_cast %2 : vector<2x128xf32> to vector<2x1x128xf32>
    %51 = vector.broadcast %49 : vector<1x32x128xf32> to vector<2x32x128xf32>
    %52 = vector.broadcast %50 : vector<2x1x128xf32> to vector<2x32x128xf32>
    %53 = arith.addf %51, %52 : vector<2x32x128xf32>
    %cst_22 = arith.constant dense<0xFF800000> : vector<2x32xf32>
    %54 = vector.multi_reduction <maximumf>, %53, %cst_22 [2] : vector<2x32x128xf32> to vector<2x32xf32>
    %55 = vector.extract_strided_slice %4 {offsets = [32, 0], sizes = [32, 32], strides = [1, 1]} : vector<160x32xf32> to vector<32x32xf32>
    %56 = vector.extract_strided_slice %4 {offsets = [64, 0], sizes = [32, 32], strides = [1, 1]} : vector<160x32xf32> to vector<32x32xf32>
    %57 = vector.extract_strided_slice %5 {offsets = [0, 4], sizes = [32, 1], strides = [1, 1]} : vector<32x12xf32> to vector<32x1xf32>
    %58 = vector.extract_strided_slice %5 {offsets = [0, 5], sizes = [32, 1], strides = [1, 1]} : vector<32x12xf32> to vector<32x1xf32>
    %59 = vector.extract_strided_slice %5 {offsets = [0, 6], sizes = [32, 1], strides = [1, 1]} : vector<32x12xf32> to vector<32x1xf32>
    %60 = vector.extract_strided_slice %5 {offsets = [0, 7], sizes = [32, 1], strides = [1, 1]} : vector<32x12xf32> to vector<32x1xf32>
    %cst_23 = arith.constant dense<0.000000e+00> : vector<32x128xf32>
    %61 = tpu.matmul %48, %1, %cst_23 {dimension_numbers = #tpu.dot_dimension_numbers<[1], [0], [0], [1], [0, 0, 1, 1], [], []>} : vector<32x128xf32>, vector<128x128xf32>, vector<32x128xf32> -> vector<32x128xf32>
    %cst_24 = arith.constant dense<0.000000e+00> : vector<32x128xf32>
    %62 = tpu.matmul %55, %61, %cst_24 {dimension_numbers = #tpu.dot_dimension_numbers<[1], [0], [0], [1], [0, 0, 1, 1], [], []>} : vector<32x32xf32>, vector<32x128xf32>, vector<32x128xf32> -> vector<32x128xf32>
    %63 = vector.broadcast %57 : vector<32x1xf32> to vector<32x128xf32>
    %64 = arith.addf %62, %63 : vector<32x128xf32>
    %cst_25 = arith.constant 0.000000e+00 : f32
    %65 = vector.broadcast %cst_25 : f32 to vector<32x128xf32>
    %66 = arith.maximumf %64, %65 : vector<32x128xf32>
    %cst_26 = arith.constant dense<0.000000e+00> : vector<32x128xf32>
    %67 = tpu.matmul %56, %66, %cst_26 {dimension_numbers = #tpu.dot_dimension_numbers<[1], [0], [0], [1], [0, 0, 1, 1], [], []>} : vector<32x32xf32>, vector<32x128xf32>, vector<32x128xf32> -> vector<32x128xf32>
    %68 = vector.broadcast %58 : vector<32x1xf32> to vector<32x128xf32>
    %69 = arith.addf %67, %68 : vector<32x128xf32>
    %cst_27 = arith.constant 0.000000e+00 : f32
    %70 = vector.broadcast %cst_27 : f32 to vector<32x128xf32>
    %71 = arith.maximumf %69, %70 : vector<32x128xf32>
    %72 = vector.broadcast %3 : vector<1x128xf32> to vector<32x128xf32>
    %73 = arith.mulf %71, %72 : vector<32x128xf32>
    %74 = arith.mulf %73, %73 : vector<32x128xf32>
    %75 = tpu.concatenate %73, %74 in 0 : vector<32x128xf32>, vector<32x128xf32> -> vector<64x128xf32>
    %cst_28 = arith.constant dense<0.000000e+00> : vector<64xf32>
    %76 = vector.multi_reduction <add>, %75, %cst_28 [1] : vector<64x128xf32> to vector<64xf32>
    %77 = vector.shape_cast %76 : vector<64xf32> to vector<64x1xf32>
    %78 = vector.extract_strided_slice %77 {offsets = [0, 0], sizes = [32, 1], strides = [1, 1]} : vector<64x1xf32> to vector<32x1xf32>
    %cst_29 = arith.constant 3.125000e-02 : f32
    %79 = vector.broadcast %cst_29 : f32 to vector<32x1xf32>
    %80 = arith.mulf %78, %79 : vector<32x1xf32>
    %81 = vector.extract_strided_slice %77 {offsets = [32, 0], sizes = [32, 1], strides = [1, 1]} : vector<64x1xf32> to vector<32x1xf32>
    %cst_30 = arith.constant 3.125000e-02 : f32
    %82 = vector.broadcast %cst_30 : f32 to vector<32x1xf32>
    %83 = arith.mulf %81, %82 : vector<32x1xf32>
    %84 = arith.mulf %80, %80 : vector<32x1xf32>
    %85 = arith.subf %83, %84 : vector<32x1xf32>
    %cst_31 = arith.constant 0.000000e+00 : f32
    %86 = vector.broadcast %cst_31 : f32 to vector<32x1xf32>
    %87 = arith.maximumf %85, %86 : vector<32x1xf32>
    %cst_32 = arith.constant 9.99999974E-6 : f32
    %88 = vector.broadcast %cst_32 : f32 to vector<32x1xf32>
    %89 = arith.addf %87, %88 : vector<32x1xf32>
    %90 = math.rsqrt %89 : vector<32x1xf32>
    %91 = arith.mulf %59, %90 : vector<32x1xf32>
    %92 = arith.mulf %80, %91 : vector<32x1xf32>
    %93 = arith.subf %60, %92 : vector<32x1xf32>
    %94 = vector.broadcast %91 : vector<32x1xf32> to vector<32x128xf32>
    %95 = arith.mulf %71, %94 : vector<32x128xf32>
    %96 = vector.broadcast %93 : vector<32x1xf32> to vector<32x128xf32>
    %97 = arith.addf %95, %96 : vector<32x128xf32>
    %98 = vector.shape_cast %97 : vector<32x128xf32> to vector<1x32x128xf32>
    %99 = vector.shape_cast %2 : vector<2x128xf32> to vector<2x1x128xf32>
    %100 = vector.broadcast %98 : vector<1x32x128xf32> to vector<2x32x128xf32>
    %101 = vector.broadcast %99 : vector<2x1x128xf32> to vector<2x32x128xf32>
    %102 = arith.addf %100, %101 : vector<2x32x128xf32>
    %cst_33 = arith.constant dense<0xFF800000> : vector<2x32xf32>
    %103 = vector.multi_reduction <maximumf>, %102, %cst_33 [2] : vector<2x32x128xf32> to vector<2x32xf32>
    %104 = vector.extract_strided_slice %4 {offsets = [96, 0], sizes = [32, 32], strides = [1, 1]} : vector<160x32xf32> to vector<32x32xf32>
    %105 = vector.extract_strided_slice %4 {offsets = [128, 0], sizes = [32, 32], strides = [1, 1]} : vector<160x32xf32> to vector<32x32xf32>
    %106 = vector.extract_strided_slice %5 {offsets = [0, 8], sizes = [32, 1], strides = [1, 1]} : vector<32x12xf32> to vector<32x1xf32>
    %107 = vector.extract_strided_slice %5 {offsets = [0, 9], sizes = [32, 1], strides = [1, 1]} : vector<32x12xf32> to vector<32x1xf32>
    %108 = vector.extract_strided_slice %5 {offsets = [0, 10], sizes = [32, 1], strides = [1, 1]} : vector<32x12xf32> to vector<32x1xf32>
    %109 = vector.extract_strided_slice %5 {offsets = [0, 11], sizes = [32, 1], strides = [1, 1]} : vector<32x12xf32> to vector<32x1xf32>
    %cst_34 = arith.constant dense<0.000000e+00> : vector<32x128xf32>
    %110 = tpu.matmul %97, %1, %cst_34 {dimension_numbers = #tpu.dot_dimension_numbers<[1], [0], [0], [1], [0, 0, 1, 1], [], []>} : vector<32x128xf32>, vector<128x128xf32>, vector<32x128xf32> -> vector<32x128xf32>
    %cst_35 = arith.constant dense<0.000000e+00> : vector<32x128xf32>
    %111 = tpu.matmul %104, %110, %cst_35 {dimension_numbers = #tpu.dot_dimension_numbers<[1], [0], [0], [1], [0, 0, 1, 1], [], []>} : vector<32x32xf32>, vector<32x128xf32>, vector<32x128xf32> -> vector<32x128xf32>
    %112 = vector.broadcast %106 : vector<32x1xf32> to vector<32x128xf32>
    %113 = arith.addf %111, %112 : vector<32x128xf32>
    %cst_36 = arith.constant 0.000000e+00 : f32
    %114 = vector.broadcast %cst_36 : f32 to vector<32x128xf32>
    %115 = arith.maximumf %113, %114 : vector<32x128xf32>
    %cst_37 = arith.constant dense<0.000000e+00> : vector<32x128xf32>
    %116 = tpu.matmul %105, %115, %cst_37 {dimension_numbers = #tpu.dot_dimension_numbers<[1], [0], [0], [1], [0, 0, 1, 1], [], []>} : vector<32x32xf32>, vector<32x128xf32>, vector<32x128xf32> -> vector<32x128xf32>
    %117 = vector.broadcast %107 : vector<32x1xf32> to vector<32x128xf32>
    %118 = arith.addf %116, %117 : vector<32x128xf32>
    %cst_38 = arith.constant 0.000000e+00 : f32
    %119 = vector.broadcast %cst_38 : f32 to vector<32x128xf32>
    %120 = arith.maximumf %118, %119 : vector<32x128xf32>
    %121 = vector.broadcast %3 : vector<1x128xf32> to vector<32x128xf32>
    %122 = arith.mulf %120, %121 : vector<32x128xf32>
    %123 = arith.mulf %122, %122 : vector<32x128xf32>
    %124 = tpu.concatenate %122, %123 in 0 : vector<32x128xf32>, vector<32x128xf32> -> vector<64x128xf32>
    %cst_39 = arith.constant dense<0.000000e+00> : vector<64xf32>
    %125 = vector.multi_reduction <add>, %124, %cst_39 [1] : vector<64x128xf32> to vector<64xf32>
    %126 = vector.shape_cast %125 : vector<64xf32> to vector<64x1xf32>
    %127 = vector.extract_strided_slice %126 {offsets = [0, 0], sizes = [32, 1], strides = [1, 1]} : vector<64x1xf32> to vector<32x1xf32>
    %cst_40 = arith.constant 3.125000e-02 : f32
    %128 = vector.broadcast %cst_40 : f32 to vector<32x1xf32>
    %129 = arith.mulf %127, %128 : vector<32x1xf32>
    %130 = vector.extract_strided_slice %126 {offsets = [32, 0], sizes = [32, 1], strides = [1, 1]} : vector<64x1xf32> to vector<32x1xf32>
    %cst_41 = arith.constant 3.125000e-02 : f32
    %131 = vector.broadcast %cst_41 : f32 to vector<32x1xf32>
    %132 = arith.mulf %130, %131 : vector<32x1xf32>
    %133 = arith.mulf %129, %129 : vector<32x1xf32>
    %134 = arith.subf %132, %133 : vector<32x1xf32>
    %cst_42 = arith.constant 0.000000e+00 : f32
    %135 = vector.broadcast %cst_42 : f32 to vector<32x1xf32>
    %136 = arith.maximumf %134, %135 : vector<32x1xf32>
    %cst_43 = arith.constant 9.99999974E-6 : f32
    %137 = vector.broadcast %cst_43 : f32 to vector<32x1xf32>
    %138 = arith.addf %136, %137 : vector<32x1xf32>
    %139 = math.rsqrt %138 : vector<32x1xf32>
    %140 = arith.mulf %108, %139 : vector<32x1xf32>
    %141 = arith.mulf %129, %140 : vector<32x1xf32>
    %142 = arith.subf %109, %141 : vector<32x1xf32>
    %143 = vector.broadcast %140 : vector<32x1xf32> to vector<32x128xf32>
    %144 = arith.mulf %120, %143 : vector<32x128xf32>
    %145 = vector.broadcast %142 : vector<32x1xf32> to vector<32x128xf32>
    %146 = arith.addf %144, %145 : vector<32x128xf32>
    %147 = vector.shape_cast %146 : vector<32x128xf32> to vector<1x32x128xf32>
    %148 = vector.shape_cast %2 : vector<2x128xf32> to vector<2x1x128xf32>
    %149 = vector.broadcast %147 : vector<1x32x128xf32> to vector<2x32x128xf32>
    %150 = vector.broadcast %148 : vector<2x1x128xf32> to vector<2x32x128xf32>
    %151 = arith.addf %149, %150 : vector<2x32x128xf32>
    %cst_44 = arith.constant dense<0xFF800000> : vector<2x32xf32>
    %152 = vector.multi_reduction <maximumf>, %151, %cst_44 [2] : vector<2x32x128xf32> to vector<2x32xf32>
    %153 = tpu.concatenate %54, %103, %152 in 1 : vector<2x32xf32>, vector<2x32xf32>, vector<2x32xf32> -> vector<2x96xf32>
    %c0_45 = arith.constant 0 : index
    %c0_46 = arith.constant 0 : index
    %154 = vector.load %arg7[%c0_45, %c0_46] : memref<96x256xf32, #tpu.memory_space<vmem>>, vector<96x256xf32>
    %cst_47 = arith.constant dense<0.000000e+00> : vector<2x256xf32>
    %155 = tpu.matmul %153, %154, %cst_47 {dimension_numbers = #tpu.dot_dimension_numbers<[1], [0], [0], [1], [0, 0, 1, 1], [], []>} : vector<2x96xf32>, vector<96x256xf32>, vector<2x256xf32> -> vector<2x256xf32>
    %c0_48 = arith.constant 0 : index
    %c0_49 = arith.constant 0 : index
    %156 = vector.load %arg8[%c0_48, %c0_49] : memref<1x256xf32, #tpu.memory_space<vmem>>, vector<1x256xf32>
    %157 = vector.broadcast %156 : vector<1x256xf32> to vector<2x256xf32>
    %158 = arith.addf %155, %157 : vector<2x256xf32>
    %cst_50 = arith.constant 0.000000e+00 : f32
    %159 = vector.broadcast %cst_50 : f32 to vector<2x256xf32>
    %160 = arith.maximumf %158, %159 : vector<2x256xf32>
    %c0_51 = arith.constant 0 : index
    %c0_52 = arith.constant 0 : index
    %161 = vector.load %arg9[%c0_51, %c0_52] : memref<2x256xf32, #tpu.memory_space<vmem>>, vector<2x256xf32>
    tpu.vector_store %arg9[%c0_51, %c0_52], %160 {strides = array<i32>} : memref<2x256xf32, #tpu.memory_space<vmem>>, vector<2x256xf32>,
    return
  }
}

</mosaic_0001>

<bundles_post_ra>
// kernel: tpu_custom_call.1
= control target key start
LH: loop header
LB: loop body
LE: loop exit
PB: predicated region body
PF: predicated region fallthrough
CT: control target
= control target key end

     0   :  { %14 = vsyncpa [#allocation3], 0  ;;  %s2158_s0 = inlined_call_operand.vmem [shape: f32[80,128], index: 0, kind: input, shape index: {}]   ;;  %s2159_s1 = inlined_call_operand.hbm [shape: f32[128,128], index: 1, kind: input, shape index: {}]   ;;  %s2160_s2 = inlined_call_operand.vmem [shape: f32[2,128], index: 2, kind: input, shape index: {}]   ;;  %s2161_s3 = inlined_call_operand.vmem [shape: f32[1,128], index: 3, kind: input, shape index: {}]   ;;  %s2162_s4 = inlined_call_operand.hbm [shape: f32[32,80], index: 4, kind: input, shape index: {}]   ;;  %s2163_s5 = inlined_call_operand.vmem [shape: f32[160,32], index: 5, kind: input, shape index: {}]   ;;  %s2164_s6 = inlined_call_operand.vmem [shape: f32[32,12], index: 6, kind: input, shape index: {}]   ;;  %s2165_s7 = inlined_call_operand.vmem [shape: f32[96,256], index: 7, kind: input, shape index: {}]   ;;  %s2166_s8 = inlined_call_operand.vmem [shape: f32[1,256], index: 8, kind: input, shape index: {}]   ;;  %s2167_s9 = inlined_call_operand.hbm [shape: f32[2,256], index: 9, kind: output, shape index: {}]  }
   0x1   :  { %15 = vsyncpa [#allocation6], 0 }
   0x2   :  { %16 = vsyncpa [#allocation4], 0  ;;  %s23_s11 = sshll.u32 %s2159_s1, 4  ;;  %s1557_s12 = smov [#allocation2]   ;;  %s24_s11 = int_to_ptr.hbm [resolvable:$true] %s23_s11 }
   0x3   :  { %s25_s13 = sshll.u32 %s1557_s12, 4  ;;  %s40_s16 = sshll.u32 %s2162_s4, 4  ;;  %s26_s13 = int_to_ptr.vmem [resolvable:$true] %s25_s13  ;;  %s41_s16 = int_to_ptr.hbm [resolvable:$true] %s40_s16 }
   0x4   :  { %s1558_s17 = smov 128   ;;  %s1559_s18 = smov 8  }
   0x5   :  { %31 = dma.hbm_to_vmem [thread:$0]  %s24_s11, 2048, %s26_s13, [#allocation3], %s1558_s17, %s1558_s17, %s1559_s18  }
   0x6   :  { %s1560_s19 = smov [#allocation5]  }
   0x7   :  { %s42_s20 = sshll.u32 %s1560_s19, 4  ;;  %s43_s20 = int_to_ptr.vmem [resolvable:$true] %s42_s20 }
   0x8   :  { %48 = dma.hbm_to_vmem [thread:$0]  %s41_s16, 512, %s43_s20, [#allocation6], %s1558_s17, %s1558_s17, %s1559_s18  }
   0x9   :  { %1551 = dma.done.wait [#allocation3], 2048  }
   0xa   :  { %1552 = vsyncadd [#allocation3], 4294965248 }
   0xb   :  { %1553 = dma.done.wait [#allocation6], 512  }
   0xc   :  { %1554 = vsyncadd [#allocation6], 4294966784  ;;  %v90_v0 = vld [vmem:[#allocation2 + $0x78] sm:$0xff]  ;;  %v89_v1 = vld [vmem:[#allocation2 + $0x70] sm:$0xff]  ;;  %v1561_v35 = vmov 0   ;;  %vm188_vm0 = vcmask 654336  }
   0xd   :  { %121 = vmatpush.msra.mxu0 %v90_v0  ;;  %493 = vmatpush.msra.mxu3 %v90_v0  ;;  %v88_v2 = vld [vmem:[#allocation2 + $0x68] sm:$0xff]  ;;  %v87_v3 = vld [vmem:[#allocation2 + $0x60] sm:$0xff]  ;;  %v86_v4 = vld [vmem:[#allocation2 + $0x58] sm:$0xff]  ;;  %v1562_v59 = vmov 1   ;;  %vm250_vm1 = vcmask 261120   ;;  %s1564_s12 = smov 1  }
   0xe   :  { %v85_v5 = vld [vmem:[#allocation2 + $0x50] sm:$0xff]  ;;  %v84_v6 = vld [vmem:[#allocation2 + $0x48] sm:$0xff]  ;;  %v83_v7 = vld [vmem:[#allocation2 + $0x40] sm:$0xff]  ;;  %1415 = vset.pattern.permute.xlu1 %v1561_v35  ;;  %1414 = vset.pattern.permute.xlu0 %v1561_v35  ;;  %s1574_s21 = smov [#allocation7]   ;;  %s1359_s25 = sshll.u32 %s2167_s9, 4  ;;  %s1360_s25 = int_to_ptr.hbm [resolvable:$true] %s1359_s25 }
   0xf   :  { %122 = vmatpush.msra.mxu0 %v89_v1  ;;  %494 = vmatpush.msra.mxu3 %v89_v1  ;;  %v82_v8 = vld [vmem:[#allocation2 + $0x38] sm:$0xff]  ;;  %v81_v9 = vld [vmem:[#allocation2 + $0x30] sm:$0xff]  ;;  %v80_v10 = vld [vmem:[#allocation2 + $0x28] sm:$0xff]  ;;  %s1357_s22 = sshll.u32 %s1574_s21, 4  ;;  %s1358_s22 = int_to_ptr.vmem [resolvable:$true] %s1357_s22 }
  0x10   :  { %v79_v11 = vld [vmem:[#allocation2 + $0x20] sm:$0xff]  ;;  %v78_v12 = vld [vmem:[#allocation2 + $0x18] sm:$0xff]  ;;  %v77_v13 = vld [vmem:[#allocation2 + $0x10] sm:$0xff]  ;;  %1416 = vset.pattern.permute.xlu2 %v1562_v59 }
  0x11   :  { %123 = vmatpush.msra.mxu0 %v88_v2  ;;  %495 = vmatpush.msra.mxu3 %v88_v2  ;;  %v76_v14 = vld [vmem:[#allocation2 + $0x8] sm:$0xff]  ;;  %v75_v15 = vld [vmem:[#allocation2] sm:$0xff]  ;;  %v67_v18 = vld [vmem:[%s2158_s0 + $0x10] sm:$0xff] }
  0x12   :  { %v65_v16 = vld [vmem:[%s2158_s0] sm:$0xff]  ;;  %v66_v17 = vld [vmem:[%s2158_s0 + $0x8] sm:$0xff]  ;;  %v68_v19 = vld [vmem:[%s2158_s0 + $0x18] sm:$0xff] }
  0x13   :  { %124 = vmatpush.msra.mxu0 %v87_v3  ;;  %496 = vmatpush.msra.mxu3 %v87_v3  ;;  %v69_v20 = vld [vmem:[%s2158_s0 + $0x20] sm:$0xff]  ;;  %v70_v21 = vld [vmem:[%s2158_s0 + $0x28] sm:$0xff]  ;;  %v71_v22 = vld [vmem:[%s2158_s0 + $0x30] sm:$0xff] }
  0x14   :  { %v72_v23 = vld [vmem:[%s2158_s0 + $0x38] sm:$0xff]  ;;  %v73_v24 = vld [vmem:[%s2158_s0 + $0x40] sm:$0xff]  ;;  %v74_v25 = vld [vmem:[%s2158_s0 + $0x48] sm:$0xff] }
  0x15   :  { %125 = vmatpush.msra.mxu0 %v86_v4  ;;  %497 = vmatpush.msra.mxu3 %v86_v4  ;;  %v1664_v34 = vld [vmem:[%s2164_s6 + $0x8] sm:$0xff]  ;;  %v1670_v37 = vld [vmem:[%s2164_s6] sm:$0xff]  ;;  %v1676_v39 = vld [vmem:[%s2164_s6 + $0x18] sm:$0xff] }
  0x16   :  { %175 = vperm.xlu1 %1415, %v1664_v34   ;;  %185 = vperm.xlu0 %1414, %v1676_v39   ;;  %v1682_v40 = vld [vmem:[%s2164_s6 + $0x10] sm:$0xff]  ;;  %v117_v41 = vld [vmem:[#allocation5] sm:$0xff]  ;;  %v118_v42 = vld [vmem:[#allocation5 + $0x8] sm:$0xff] }
  0x17   :  { %126 = vmatpush.msra.mxu0 %v85_v5  ;;  %498 = vmatpush.msra.mxu3 %v85_v5  ;;  %v119_v43 = vld [vmem:[#allocation5 + $0x10] sm:$0xff]  ;;  %v120_v44 = vld [vmem:[#allocation5 + $0x18] sm:$0xff]  ;;  %v93_v62 = vld [vmem:[%s2163_s5] sm:$0xff] }
  0x18   :  { %235 = vperm.xlu2 %1416, %v1670_v37   ;;  %v94_v63 = vld [vmem:[%s2163_s5 + $0x8] sm:$0xff] }
  0x19   :  { %127 = vmatpush.msra.mxu0 %v84_v6  ;;  %499 = vmatpush.msra.mxu3 %v84_v6 }
  0x1b   :  { %128 = vmatpush.msra.mxu0 %v83_v7  ;;  %500 = vmatpush.msra.mxu3 %v83_v7 }
  0x1d   :  { %129 = vmatpush.msra.mxu0 %v82_v8  ;;  %501 = vmatpush.msra.mxu3 %v82_v8 }
  0x1e   :  { %170 = vperm.xlu1 %1415, %v1670_v37   ;;  %180 = vperm.xlu0 %1414, %v1682_v40  }
  0x1f   :  { %130 = vmatpush.msra.mxu0 %v81_v9  ;;  %502 = vmatpush.msra.mxu3 %v81_v9 }
  0x20   :  { %239 = vperm.xlu2 %1416, %v1664_v34  }
  0x21   :  { %131 = vmatpush.msra.mxu0 %v80_v10  ;;  %503 = vmatpush.msra.mxu3 %v80_v10 }
  0x23   :  { %132 = vmatpush.msra.mxu0 %v79_v11  ;;  %504 = vmatpush.msra.mxu3 %v79_v11 }
  0x25   :  { %133 = vmatpush.msra.mxu0 %v78_v12  ;;  %505 = vmatpush.msra.mxu3 %v78_v12 }
  0x26   :  { %1417 = vset.pattern.permute.xlu0 %v1562_v59  ;;  %1418 = vset.pattern.permute.xlu1 %v1562_v59 }
  0x27   :  { %134 = vmatpush.msra.mxu0 %v77_v13  ;;  %506 = vmatpush.msra.mxu3 %v77_v13 }
  0x28   :  { %243 = vperm.xlu0 %1417, %v1682_v40   ;;  %247 = vperm.xlu1 %1418, %v1676_v39  }
  0x29   :  { %135 = vmatpush.msra.mxu0 %v76_v14  ;;  %507 = vmatpush.msra.mxu3 %v76_v14 }
  0x2b   :  { %136 = vmatpush.msra.mxu0 %v75_v15  ;;  %508 = vmatpush.msra.mxu3 %v75_v15 }
  0x2c   :  { %137 = vmatmul.f32.vlgmr.msra.gmra.mxu0 %v65_v16 }
  0x2d   :  { %832 = vmatpush.msrb.mxu3 %v90_v0  ;;  %v95_v0 = vld [vmem:[%s2163_s5 + $0x10] sm:$0xff] }
  0x2f   :  { %833 = vmatpush.msrb.mxu3 %v89_v1  ;;  %v96_v1 = vld [vmem:[%s2163_s5 + $0x18] sm:$0xff] }
  0x31   :  { %834 = vmatpush.msrb.mxu3 %v88_v2 }
  0x33   :  { %835 = vmatpush.msrb.mxu3 %v87_v3 }
  0x34   :  { %140 = vmatmul.f32.gmra.mxu0 %v66_v17 }
  0x35   :  { %836 = vmatpush.msrb.mxu3 %v86_v4 }
  0x37   :  { %837 = vmatpush.msrb.mxu3 %v85_v5  ;;  %v1710_v5 = vld [vmem:[%s2161_s3] ss:$0 sm:$0xff] }
  0x39   :  { %838 = vmatpush.msrb.mxu3 %v84_v6 }
  0x3b   :  { %839 = vmatpush.msrb.mxu3 %v83_v7 }
  0x3c   :  { %143 = vmatmul.f32.gmra.mxu0 %v67_v18 }
  0x3d   :  { %840 = vmatpush.msrb.mxu3 %v82_v8 }
  0x3f   :  { %841 = vmatpush.msrb.mxu3 %v81_v9 }
  0x41   :  { %842 = vmatpush.msrb.mxu3 %v80_v10 }
  0x43   :  { %843 = vmatpush.msrb.mxu3 %v79_v11 }
  0x44   :  { %146 = vmatmul.f32.gmra.mxu0 %v68_v19 }
  0x45   :  { %844 = vmatpush.msrb.mxu3 %v78_v12 }
  0x47   :  { %845 = vmatpush.msrb.mxu3 %v77_v13 }
  0x49   :  { %846 = vmatpush.msrb.mxu3 %v76_v14 }
  0x4b   :  { %847 = vmatpush.msrb.mxu3 %v75_v15 }
  0x4c   :  { %149 = vmatmul.f32.gmra.mxu0 %v69_v20 }
  0x54   :  { %152 = vmatmul.f32.gmra.mxu0 %v70_v21 }
  0x5c   :  { %155 = vmatmul.f32.gmra.mxu0 %v71_v22 }
  0x64   :  { %158 = vmatmul.f32.gmra.mxu0 %v72_v23 }
  0x6c   :  { %161 = vmatmul.f32.gmra.mxu0 %v73_v24 }
  0x72   :  { %v236_v2 = vpop.permute.xlu2 %235 }
  0x74   :  { %164 = vmatmul.f32.gmra.mxu0 %v74_v25 }
  0x7a   :  { %v240_v9 = vpop.permute.xlu2 %239 }
  0x88   :  { %v186_v47 = vpop.permute.xlu0 %185  ;;  %v176_v48 = vpop.permute.xlu1 %175 }
  0x90   :  { %v181_v50 = vpop.permute.xlu0 %180  ;;  %v171_v54 = vpop.permute.xlu1 %170 }
  0x9a   :  { %v244_v14 = vpop.permute.xlu0 %243  ;;  %v248_v20 = vpop.permute.xlu1 %247 }
  0xa9   :  { %v138_v26 = vpop.f32.mrf.mxu0 }
  0xb1   :  { %v141_v27 = vpop.f32.mrf.mxu0 }
  0xb9   :  { %v144_v28 = vpop.f32.mrf.mxu0 }
  0xc1   :  { %v147_v29 = vpop.f32.mrf.mxu0 }
  0xc9   :  { %v150_v30 = vpop.f32.mrf.mxu0 }
  0xd1   :  { %v153_v31 = vpop.f32.mrf.mxu0 }
  0xd9   :  { %v156_v32 = vpop.f32.mrf.mxu0 }
  0xe1   :  { %v159_v33 = vpop.f32.mrf.mxu0 }
  0xe9   :  { %v162_v36 = vpop.f32.mrf.mxu0 }
  0xf1   :  { %v165_v38 = vpop.f32.mrf.mxu0 }
  0xf2   :  { %207 = vmatpush.msra.mxu1 %v165_v38 }
  0xf4   :  { %208 = vmatpush.msra.mxu1 %v162_v36 }
  0xf6   :  { %209 = vmatpush.msra.mxu1 %v159_v33 }
  0xf8   :  { %210 = vmatpush.msra.mxu1 %v156_v32 }
  0xfa   :  { %211 = vmatpush.msra.mxu1 %v153_v31 }
  0xfc   :  { %212 = vmatpush.msra.mxu1 %v150_v30 }
  0xfe   :  { %213 = vmatpush.msra.mxu1 %v147_v29 }
 0x100   :  { %214 = vmatpush.msra.mxu1 %v144_v28 }
 0x102   :  { %215 = vmatpush.msra.mxu1 %v141_v27 }
 0x104   :  { %216 = vmatpush.msra.mxu1 %v138_v26 }
 0x105   :  { %1370 = vmatmul.msk.f32.vlgmr.msra.gmra.mxu1 %vm188_vm0, %v117_v41 }
 0x10d   :  { %1371 = vmatmul.msk.f32.gmra.mxu1 %vm188_vm0, %v118_v42 }
 0x115   :  { %1372 = vmatmul.msk.f32.gmra.mxu1 %vm188_vm0, %v119_v43 }
 0x11d   :  { %1373 = vmatmul.msk.f32.gmra.mxu1 %vm188_vm0, %v120_v44 }
 0x182   :  { %v218_v45 = vpop.f32.mrf.mxu1 }
 0x183   :  { %v219_v57 = vadd.f32 %v218_v45, %v171_v54 }
 0x185   :  { %v230_v61 = vmax.f32 %v219_v57, 0.0 }
 0x18a   :  { %v221_v46 = vpop.f32.mrf.mxu1 }
 0x18b   :  { %v222_v55 = vadd.f32 %v221_v46, %v176_v48 }
 0x18d   :  { %v231_v60 = vmax.f32 %v222_v55, 0.0  ;;  %v1563_v55 = vmov 2  }
 0x18e   :  { %1419 = vset.pattern.permute.xlu0 %v1563_v55  ;;  %1420 = vset.pattern.permute.xlu1 %v1563_v55 }
 0x192   :  { %v224_v49 = vpop.f32.mrf.mxu1 }
 0x193   :  { %v225_v52 = vadd.f32 %v224_v49, %v181_v50 }
 0x195   :  { %v232_v58 = vmax.f32 %v225_v52, 0.0 }
 0x19a   :  { %v227_v51 = vpop.f32.mrf.mxu1 }
 0x19b   :  { %v228_v53 = vadd.f32 %v227_v51, %v186_v47 }
 0x19d   :  { %v233_v56 = vmax.f32 %v228_v53, 0.0 }
 0x19f   :  { %275 = vmatpush.msra.mxu2 %v233_v56 }
 0x1a1   :  { %276 = vmatpush.msra.mxu2 %v232_v58 }
 0x1a3   :  { %277 = vmatpush.msra.mxu2 %v231_v60 }
 0x1a5   :  { %278 = vmatpush.msra.mxu2 %v230_v61 }
 0x1a6   :  { %1374 = vmatmul.msk.f32.vlgmr.msra.gmra.mxu2 %vm250_vm1, %v93_v62 }
 0x1ae   :  { %1375 = vmatmul.msk.f32.gmra.mxu2 %vm250_vm1, %v94_v63 }
 0x1b6   :  { %1376 = vmatmul.msk.f32.gmra.mxu2 %vm250_vm1, %v95_v0 }
 0x1be   :  { %1377 = vmatmul.msk.f32.gmra.mxu2 %vm250_vm1, %v96_v1 }
 0x229   :  { %v280_v3 = vpop.f32.mrf.mxu2 }
 0x22a   :  { %v1705_v4 = vadd.f32 %v280_v3, %v236_v2 }
 0x22c   :  { %v292_v6 = vmax.f32 %v1705_v4, 0.0 }
 0x22e   :  { %v299_v7 = vmul.f32 %v1710_v5, %v292_v6 }
 0x230   :  { %307 = vadd.xlane.f32.xlu2 %v299_v7  ;;  %v303_v8 = vmul.f32 %v299_v7, %v299_v7 }
 0x231   :  { %v283_v10 = vpop.f32.mrf.mxu2 }
 0x232   :  { %v1716_v11 = vadd.f32 %v283_v10, %v240_v9  ;;  %315 = vadd.xlane.f32.xlu1 %v303_v8 }
 0x234   :  { %v293_v12 = vmax.f32 %v1716_v11, 0.0 }
 0x236   :  { %v300_v13 = vmul.f32 %v1710_v5, %v293_v12 }
 0x238   :  { %309 = vadd.xlane.f32.xlu0 %v300_v13  ;;  %v304_v15 = vmul.f32 %v300_v13, %v300_v13 }
 0x239   :  { %v286_v16 = vpop.f32.mrf.mxu2 }
 0x23a   :  { %317 = vadd.xlane.f32.xlu2 %v304_v15  ;;  %v1722_v17 = vadd.f32 %v286_v16, %v244_v14 }
 0x23c   :  { %v294_v18 = vmax.f32 %v1722_v17, 0.0 }
 0x23e   :  { %v301_v19 = vmul.f32 %v1710_v5, %v294_v18 }
 0x240   :  { %v305_v21 = vmul.f32 %v301_v19, %v301_v19 }
 0x241   :  { %v289_v22 = vpop.f32.mrf.mxu2 }
 0x242   :  { %311 = vadd.xlane.f32.xlu2 %v301_v19  ;;  %v1728_v23 = vadd.f32 %v289_v22, %v248_v20  ;;  %319 = vadd.xlane.f32.xlu1 %v305_v21 }
 0x244   :  { %v295_v24 = vmax.f32 %v1728_v23, 0.0  ;;  %v98_v23 = vld [vmem:[%s2163_s5 + $0x28] sm:$0xff] }
 0x246   :  { %v302_v25 = vmul.f32 %v1710_v5, %v295_v24 }
 0x248   :  { %v306_v26 = vmul.f32 %v302_v25, %v302_v25 }
 0x24a   :  { %313 = vadd.xlane.f32.xlu2 %v302_v25  ;;  %321 = vadd.xlane.f32.xlu0 %v306_v26 }
 0x2a3   :  { %v308_v27 = vpop.xlane.xlu2 %307 }
 0x2a4   :  { %v323_v28 = vmul.f32 0.03125, %v308_v27 }
 0x2a5   :  { %v316_v29 = vpop.xlane.xlu1 %315 }
 0x2a6   :  { %v331_v30 = vmul.f32 %v323_v28, %v323_v28  ;;  %v327_v31 = vmul.f32 0.03125, %v316_v29 }
 0x2a8   :  { %v335_v32 = vsub.f32 %v327_v31, %v331_v30 }
 0x2aa   :  { %v339_v33 = vmax.f32 %v335_v32, 0.0 }
 0x2ab   :  { %v310_v35 = vpop.xlane.xlu0 %309 }
 0x2ac   :  { %v343_v36 = vadd.f32 1e-05, %v339_v33  ;;  %v324_v38 = vmul.f32 0.03125, %v310_v35 }
 0x2ad   :  { %v318_v41 = vpop.xlane.xlu2 %317 }
 0x2ae   :  { %1450 = vrsqrt.f32 %v343_v36  ;;  %v332_v42 = vmul.f32 %v324_v38, %v324_v38  ;;  %v328_v43 = vmul.f32 0.03125, %v318_v41  ;;  %vm353_vm3 = vweird.f32 %v343_v36 }
 0x2b0   :  { %v336_v44 = vsub.f32 %v328_v43, %v332_v42 }
 0x2b2   :  { %v340_v45 = vmax.f32 %v336_v44, 0.0 }
 0x2b4   :  { %v1451_v46 = vpop.eup %1450  ;;  %v344_v47 = vadd.f32 1e-05, %v340_v45 }
 0x2b5   :  { %v348_v48 = vmul.f32 %v1451_v46, %v343_v36  ;;  %v312_v49 = vpop.xlane.xlu2 %311  ;;  %v320_v50 = vpop.xlane.xlu1 %319  ;;  %vm354_vm2 = vweird.f32 %v1451_v46 }
 0x2b6   :  { %1452 = vrsqrt.f32 %v344_v47  ;;  %v325_v51 = vmul.f32 0.03125, %v312_v49  ;;  %v329_v52 = vmul.f32 0.03125, %v320_v50  ;;  %vm355_vm4 = vmor %vm353_vm3, %vm354_vm2  ;;  %vm363_vm6 = vweird.f32 %v344_v47 }
 0x2b7   :  { %v349_v53 = vmul.f32 %v1451_v46, %v348_v48  ;;  %v1565_v49 = vmov 3  }
 0x2b8   :  { %v333_v54 = vmul.f32 %v325_v51, %v325_v51  ;;  %1421 = vset.pattern.permute.xlu2 %v1565_v49 }
 0x2b9   :  { %v350_v56 = vmul.f32 0.5, %v349_v53 }
 0x2ba   :  { %v337_v57 = vsub.f32 %v329_v52, %v333_v54 }
 0x2bb   :  { %v351_v58 = vsub.f32 1.5, %v350_v56 }
 0x2bc   :  { %v1453_v59 = vpop.eup %1452  ;;  %v341_v60 = vmax.f32 %v337_v57, 0.0 }
 0x2bd   :  { %v358_v61 = vmul.f32 %v1453_v59, %v344_v47  ;;  %v314_v62 = vpop.xlane.xlu2 %313  ;;  %v322_v63 = vpop.xlane.xlu0 %321  ;;  %v352_v0 = vmul.f32 %v1451_v46, %v351_v58  ;;  %vm364_vm5 = vweird.f32 %v1453_v59 }
 0x2be   :  { %v345_v1 = vadd.f32 1e-05, %v341_v60  ;;  %v326_v2 = vmul.f32 0.03125, %v314_v62  ;;  %v330_v3 = vmul.f32 0.03125, %v322_v63  ;;  %vm365_vm7 = vmor %vm363_vm6, %vm364_vm5 }
 0x2bf   :  { %v359_v7 = vmul.f32 %v1453_v59, %v358_v61  ;;  %v356_v8 = vsel %vm355_vm4, %v1451_v46, %v352_v0 }
 0x2c0   :  { %1454 = vrsqrt.f32 %v345_v1  ;;  %v334_v9 = vmul.f32 %v326_v2, %v326_v2  ;;  %v387_v10 = vmul.f32 %v356_v8, %v1670_v37  ;;  %vm373_vm9 = vweird.f32 %v345_v1 }
 0x2c1   :  { %v360_v13 = vmul.f32 0.5, %v359_v7 }
 0x2c2   :  { %v338_v14 = vsub.f32 %v330_v3, %v334_v9  ;;  %v391_v15 = vmul.f32 %v387_v10, %v323_v28 }
 0x2c3   :  { %v361_v16 = vsub.f32 1.5, %v360_v13 }
 0x2c4   :  { %v342_v19 = vmax.f32 %v338_v14, 0.0  ;;  %399 = vrot.lane.b32.xlu1 %v391_v15, %s1564_s12  ;;  %v1566_v14 = vmov 4   ;;  %v100_v15 = vld [vmem:[%s2163_s5 + $0x38] sm:$0xff] }
 0x2c5   :  { %v362_v20 = vmul.f32 %v1453_v59, %v361_v16 }
 0x2c6   :  { %v1455_v21 = vpop.eup %1454  ;;  %v346_v22 = vadd.f32 1e-05, %v342_v19  ;;  %v1567_v19 = vmov 5  }
 0x2c7   :  { %v368_v25 = vmul.f32 %v1455_v21, %v345_v1  ;;  %v366_v26 = vsel %vm365_vm7, %v1453_v59, %v362_v20  ;;  %vm374_vm8 = vweird.f32 %v1455_v21 }
 0x2c8   :  { %1456 = vrsqrt.f32 %v346_v22  ;;  %v388_v27 = vmul.f32 %v366_v26, %v1664_v34  ;;  %vm375_vm10 = vmor %vm373_vm9, %vm374_vm8  ;;  %vm383_vm12 = vweird.f32 %v346_v22 }
 0x2c9   :  { %v369_v29 = vmul.f32 %v1455_v21, %v368_v25 }
 0x2ca   :  { %v392_v30 = vmul.f32 %v388_v27, %v324_v38 }
 0x2cb   :  { %v370_v31 = vmul.f32 0.5, %v369_v29 }
 0x2cc   :  { %401 = vrot.lane.b32.xlu2 %v392_v30, %s1564_s12 }
 0x2cd   :  { %v371_v28 = vsub.f32 1.5, %v370_v31 }
 0x2ce   :  { %v1457_v32 = vpop.eup %1456 }
 0x2cf   :  { %v378_v33 = vmul.f32 %v1457_v32, %v346_v22  ;;  %v372_v35 = vmul.f32 %v1455_v21, %v371_v28  ;;  %vm384_vm11 = vweird.f32 %v1457_v32 }
 0x2d0   :  { %vm385_vm13 = vmor %vm383_vm12, %vm384_vm11  ;;  %vm1184_vm11 = vcmask 130112   ;;  %vm1188_vm12 = vcmask 195712  }
 0x2d1   :  { %v379_v36 = vmul.f32 %v1457_v32, %v378_v33  ;;  %v376_v41 = vsel %vm375_vm10, %v1455_v21, %v372_v35 }
 0x2d2   :  { %v389_v42 = vmul.f32 %v376_v41, %v1682_v40 }
 0x2d3   :  { %v380_v43 = vmul.f32 0.5, %v379_v36 }
 0x2d4   :  { %v393_v44 = vmul.f32 %v389_v42, %v325_v51 }
 0x2d5   :  { %v381_v45 = vsub.f32 1.5, %v380_v43  ;;  %v102_v43 = vld [vmem:[%s2163_s5 + $0x48] sm:$0xff] }
 0x2d6   :  { %403 = vrot.lane.b32.xlu0 %v393_v44, %s1564_s12  ;;  %v103_v44 = vld [vmem:[%s2163_s5 + $0x50] sm:$0xff] }
 0x2d7   :  { %v382_v38 = vmul.f32 %v1457_v32, %v381_v45  ;;  %v104_v45 = vld [vmem:[%s2163_s5 + $0x58] sm:$0xff] }
 0x2d9   :  { %v386_v46 = vsel %vm385_vm13, %v1457_v32, %v382_v38 }
 0x2da   :  { %v390_v47 = vmul.f32 %v386_v46, %v1676_v39 }
 0x2dc   :  { %v394_v48 = vmul.f32 %v390_v47, %v326_v2 }
 0x2de   :  { %405 = vrot.lane.b32.xlu1 %v394_v48, %s1564_s12  ;;  %417 = vperm.xlu0 %1419, %v387_v10  }
 0x2e6   :  { %422 = vperm.xlu1 %1420, %v388_v27   ;;  %1422 = vset.pattern.permute.xlu0 %v1565_v49 }
 0x2ee   :  { %427 = vperm.xlu1 %1420, %v389_v42   ;;  %v101_v42 = vld [vmem:[%s2163_s5 + $0x40] sm:$0xff] }
 0x2f6   :  { %1424 = vset.pattern.permute.xlu1 %v1565_v49 }
 0x326   :  { %v402_v52 = vpop.permute.xlu2 %401 }
 0x327   :  { %v412_v53 = vsub.f32 %v1664_v34, %v402_v52 }
 0x336   :  { %v400_v50 = vpop.permute.xlu1 %399 }
 0x337   :  { %v411_v51 = vsub.f32 %v1670_v37, %v400_v50 }
 0x339   :  { %441 = vperm.xlu2 %1421, %v411_v51  }
 0x341   :  { %446 = vperm.xlu2 %1421, %v412_v53  }
 0x348   :  { %v404_v54 = vpop.permute.xlu0 %403 }
 0x349   :  { %v413_v56 = vsub.f32 %v1682_v40, %v404_v54  ;;  %1423 = vset.pattern.permute.xlu2 %v1563_v55 }
 0x34a   :  { %432 = vperm.xlu2 %1423, %v390_v47  }
 0x34b   :  { %451 = vperm.xlu0 %1422, %v413_v56  }
 0x350   :  { %v406_v57 = vpop.permute.xlu1 %405  ;;  %v418_v59 = vpop.permute.xlu0 %417 }
 0x351   :  { %v414_v58 = vsub.f32 %v1676_v39, %v406_v57  ;;  %v435_v60 = vmul.f32 %v418_v59, %v292_v6 }
 0x352   :  { %1425 = vset.pattern.permute.xlu2 %v1566_v14 }
 0x353   :  { %456 = vperm.xlu1 %1424, %v414_v58   ;;  %1427 = vset.pattern.permute.xlu0 %v1566_v14 }
 0x354   :  { %527 = vperm.xlu0 %1427, %v1664_v34   ;;  %535 = vperm.xlu2 %1425, %v1676_v39  }
 0x358   :  { %v423_v63 = vpop.permute.xlu1 %422 }
 0x359   :  { %v436_v0 = vmul.f32 %v423_v63, %v293_v12 }
 0x35b   :  { %1426 = vset.pattern.permute.xlu1 %v1566_v14 }
 0x35c   :  { %531 = vperm.xlu1 %1426, %v1682_v40   ;;  %523 = vperm.xlu2 %1425, %v1670_v37  }
 0x35d   :  { %1430 = vset.pattern.permute.xlu0 %v1567_v19 }
 0x35e   :  { %596 = vperm.xlu0 %1430, %v1676_v39  }
 0x360   :  { %v428_v2 = vpop.permute.xlu1 %427 }
 0x361   :  { %v437_v3 = vmul.f32 %v428_v2, %v294_v18  ;;  %v97_v18 = vld [vmem:[%s2163_s5 + $0x20] sm:$0xff] }
 0x364   :  { %1428 = vset.pattern.permute.xlu1 %v1567_v19  ;;  %1429 = vset.pattern.permute.xlu2 %v1567_v19 }
 0x365   :  { %584 = vperm.xlu1 %1428, %v1670_v37   ;;  %588 = vperm.xlu2 %1429, %v1664_v34  }
 0x36d   :  { %592 = vperm.xlu1 %1428, %v1682_v40  }
 0x393   :  { %v442_v61 = vpop.permute.xlu2 %441 }
 0x394   :  { %v1751_v62 = vadd.f32 %v442_v61, %v435_v60 }
 0x396   :  { %509 = vmatmul.f32.vlgmr.msra.gmra.mxu3 %v1751_v62 }
 0x39b   :  { %v447_v55 = vpop.permute.xlu2 %446 }
 0x39c   :  { %v1756_v1 = vadd.f32 %v447_v55, %v436_v0 }
 0x39e   :  { %512 = vmatmul.f32.gmra.mxu3 %v1756_v1 }
 0x3a4   :  { %v433_v7 = vpop.permute.xlu2 %432 }
 0x3a5   :  { %v438_v8 = vmul.f32 %v433_v7, %v295_v24  ;;  %v99_v24 = vld [vmem:[%s2163_s5 + $0x30] sm:$0xff] }
 0x3ae   :  { %v536_v21 = vpop.permute.xlu2 %535 }
 0x3b6   :  { %v524_v31 = vpop.permute.xlu2 %523 }
 0x3bd   :  { %v452_v4 = vpop.permute.xlu0 %451 }
 0x3be   :  { %v1761_v6 = vadd.f32 %v452_v4, %v437_v3 }
 0x3bf   :  { %v589_v50 = vpop.permute.xlu2 %588 }
 0x3c0   :  { %515 = vmatmul.f32.gmra.mxu3 %v1761_v6 }
 0x3c5   :  { %v457_v11 = vpop.permute.xlu1 %456 }
 0x3c6   :  { %v1766_v12 = vadd.f32 %v457_v11, %v438_v8  ;;  %v528_v26 = vpop.permute.xlu0 %527 }
 0x3c8   :  { %518 = vmatmul.f32.gmra.mxu3 %v1766_v12 }
 0x3ce   :  { %v532_v25 = vpop.permute.xlu1 %531 }
 0x3d0   :  { %v597_v0 = vpop.permute.xlu0 %596 }
 0x3d7   :  { %v585_v38 = vpop.permute.xlu1 %584 }
 0x3df   :  { %v593_v58 = vpop.permute.xlu1 %592 }
 0x419   :  { %v510_v9 = vpop.f32.mrf.mxu3 }
 0x421   :  { %v513_v10 = vpop.f32.mrf.mxu3 }
 0x443   :  { %v516_v13 = vpop.f32.mrf.mxu3 }
 0x44b   :  { %v519_v17 = vpop.f32.mrf.mxu3 }
 0x44c   :  { %562 = vmatpush.msrb.mxu2 %v519_v17 }
 0x44e   :  { %563 = vmatpush.msrb.mxu2 %v516_v13 }
 0x450   :  { %564 = vmatpush.msrb.mxu2 %v513_v10 }
 0x452   :  { %565 = vmatpush.msrb.mxu2 %v510_v9 }
 0x453   :  { %1378 = vmatmul.msk.f32.vlgmr.msrb.gmra.mxu2 %vm250_vm1, %v97_v18 }
 0x45b   :  { %1379 = vmatmul.msk.f32.gmra.mxu2 %vm250_vm1, %v98_v23 }
 0x463   :  { %1380 = vmatmul.msk.f32.gmra.mxu2 %vm250_vm1, %v99_v24 }
 0x46b   :  { %1381 = vmatmul.msk.f32.gmra.mxu2 %vm250_vm1, %v100_v15 }
 0x4d6   :  { %v567_v16 = vpop.f32.mrf.mxu2 }
 0x4d7   :  { %v568_v33 = vadd.f32 %v567_v16, %v524_v31 }
 0x4d9   :  { %v579_v41 = vmax.f32 %v568_v33, 0.0 }
 0x4de   :  { %v570_v20 = vpop.f32.mrf.mxu2 }
 0x4df   :  { %v571_v28 = vadd.f32 %v570_v20, %v528_v26 }
 0x4e1   :  { %v580_v36 = vmax.f32 %v571_v28, 0.0  ;;  %v1568_v28 = vmov 6  }
 0x4e2   :  { %1431 = vset.pattern.permute.xlu0 %v1568_v28  ;;  %1432 = vset.pattern.permute.xlu2 %v1568_v28 }
 0x4e6   :  { %v573_v22 = vpop.f32.mrf.mxu2 }
 0x4e7   :  { %v574_v29 = vadd.f32 %v573_v22, %v532_v25 }
 0x4e9   :  { %v581_v35 = vmax.f32 %v574_v29, 0.0 }
 0x4ee   :  { %v576_v27 = vpop.f32.mrf.mxu2 }
 0x4ef   :  { %v577_v30 = vadd.f32 %v576_v27, %v536_v21 }
 0x4f1   :  { %v582_v32 = vmax.f32 %v577_v30, 0.0 }
 0x4f3   :  { %623 = vmatpush.msrb.mxu1 %v582_v32 }
 0x4f5   :  { %624 = vmatpush.msrb.mxu1 %v581_v35 }
 0x4f7   :  { %625 = vmatpush.msrb.mxu1 %v580_v36 }
 0x4f9   :  { %626 = vmatpush.msrb.mxu1 %v579_v41 }
 0x4fa   :  { %1382 = vmatmul.msk.f32.vlgmr.msrb.gmra.mxu1 %vm250_vm1, %v101_v42 }
 0x502   :  { %1383 = vmatmul.msk.f32.gmra.mxu1 %vm250_vm1, %v102_v43 }
 0x50a   :  { %1384 = vmatmul.msk.f32.gmra.mxu1 %vm250_vm1, %v103_v44 }
 0x512   :  { %1385 = vmatmul.msk.f32.gmra.mxu1 %vm250_vm1, %v104_v45 }
 0x577   :  { %v628_v46 = vpop.f32.mrf.mxu1 }
 0x578   :  { %v1809_v47 = vadd.f32 %v628_v46, %v585_v38 }
 0x57a   :  { %v640_v48 = vmax.f32 %v1809_v47, 0.0 }
 0x57c   :  { %v644_v49 = vmul.f32 %v1710_v5, %v640_v48 }
 0x57e   :  { %652 = vadd.xlane.f32.xlu2 %v644_v49  ;;  %v648_v51 = vmul.f32 %v644_v49, %v644_v49 }
 0x57f   :  { %v631_v52 = vpop.f32.mrf.mxu1 }
 0x580   :  { %v1815_v53 = vadd.f32 %v631_v52, %v589_v50  ;;  %660 = vadd.xlane.f32.xlu1 %v648_v51 }
 0x582   :  { %v641_v54 = vmax.f32 %v1815_v53, 0.0 }
 0x584   :  { %v645_v56 = vmul.f32 %v1710_v5, %v641_v54 }
 0x586   :  { %654 = vadd.xlane.f32.xlu0 %v645_v56  ;;  %v649_v57 = vmul.f32 %v645_v56, %v645_v56 }
 0x587   :  { %v634_v59 = vpop.f32.mrf.mxu1 }
 0x588   :  { %v1821_v60 = vadd.f32 %v634_v59, %v593_v58  ;;  %662 = vadd.xlane.f32.xlu2 %v649_v57 }
 0x58a   :  { %v642_v61 = vmax.f32 %v1821_v60, 0.0 }
 0x58c   :  { %v646_v63 = vmul.f32 %v1710_v5, %v642_v61 }
 0x58e   :  { %656 = vadd.xlane.f32.xlu1 %v646_v63  ;;  %v650_v55 = vmul.f32 %v646_v63, %v646_v63 }
 0x58f   :  { %v637_v2 = vpop.f32.mrf.mxu1 }
 0x590   :  { %v1827_v3 = vadd.f32 %v637_v2, %v597_v0  ;;  %664 = vadd.xlane.f32.xlu2 %v650_v55 }
 0x592   :  { %v643_v4 = vmax.f32 %v1827_v3, 0.0 }
 0x594   :  { %v647_v7 = vmul.f32 %v1710_v5, %v643_v4 }
 0x596   :  { %658 = vadd.xlane.f32.xlu1 %v647_v7  ;;  %v651_v8 = vmul.f32 %v647_v7, %v647_v7 }
 0x598   :  { %666 = vadd.xlane.f32.xlu0 %v651_v8 }
 0x5f1   :  { %v653_v11 = vpop.xlane.xlu2 %652 }
 0x5f2   :  { %v668_v9 = vmul.f32 0.03125, %v653_v11 }
 0x5f3   :  { %v661_v10 = vpop.xlane.xlu1 %660 }
 0x5f4   :  { %v676_v13 = vmul.f32 %v668_v9, %v668_v9  ;;  %v672_v14 = vmul.f32 0.03125, %v661_v10 }
 0x5f6   :  { %v680_v17 = vsub.f32 %v672_v14, %v676_v13 }
 0x5f8   :  { %v684_v18 = vmax.f32 %v680_v17, 0.0 }
 0x5f9   :  { %v655_v23 = vpop.xlane.xlu0 %654 }
 0x5fa   :  { %v688_v24 = vadd.f32 1e-05, %v684_v18  ;;  %v669_v15 = vmul.f32 0.03125, %v655_v23 }
 0x5fb   :  { %v663_v16 = vpop.xlane.xlu2 %662 }
 0x5fc   :  { %1458 = vrsqrt.f32 %v688_v24  ;;  %v677_v19 = vmul.f32 %v669_v15, %v669_v15  ;;  %v673_v20 = vmul.f32 0.03125, %v663_v16  ;;  %vm698_vm15 = vweird.f32 %v688_v24 }
 0x5fe   :  { %v681_v21 = vsub.f32 %v673_v20, %v677_v19 }
 0x600   :  { %v685_v22 = vmax.f32 %v681_v21, 0.0 }
 0x601   :  { %v657_v25 = vpop.xlane.xlu1 %656 }
 0x602   :  { %v1459_v26 = vpop.eup %1458  ;;  %v689_v27 = vadd.f32 1e-05, %v685_v22  ;;  %v1833_v29 = vmul.f32 0.03125, %v657_v25 }
 0x603   :  { %v693_v30 = vmul.f32 %v1459_v26, %v688_v24  ;;  %v665_v31 = vpop.xlane.xlu2 %664  ;;  %vm699_vm14 = vweird.f32 %v1459_v26 }
 0x604   :  { %1460 = vrsqrt.f32 %v689_v27  ;;  %v678_v32 = vmul.f32 %v1833_v29, %v1833_v29  ;;  %v674_v33 = vmul.f32 0.03125, %v665_v31  ;;  %vm700_vm0 = vmor %vm698_vm15, %vm699_vm14  ;;  %vm708_vm3 = vweird.f32 %v689_v27 }
 0x605   :  { %v694_v35 = vmul.f32 %v1459_v26, %v693_v30 }
 0x606   :  { %v682_v36 = vsub.f32 %v674_v33, %v678_v32 }
 0x607   :  { %v695_v41 = vmul.f32 0.5, %v694_v35  ;;  %v1569_v35 = vmov 7  }
 0x608   :  { %v686_v42 = vmax.f32 %v682_v36, 0.0  ;;  %1433 = vset.pattern.permute.xlu1 %v1569_v35 }
 0x609   :  { %v696_v43 = vsub.f32 1.5, %v695_v41  ;;  %v659_v44 = vpop.xlane.xlu1 %658 }
 0x60a   :  { %v1461_v45 = vpop.eup %1460  ;;  %v690_v38 = vadd.f32 1e-05, %v686_v42  ;;  %v671_v46 = vmul.f32 0.03125, %v659_v44 }
 0x60b   :  { %v703_v49 = vmul.f32 %v1461_v45, %v689_v27  ;;  %v667_v50 = vpop.xlane.xlu0 %666  ;;  %v697_v51 = vmul.f32 %v1459_v26, %v696_v43  ;;  %vm709_vm2 = vweird.f32 %v1461_v45 }
 0x60c   :  { %1462 = vrsqrt.f32 %v690_v38  ;;  %v679_v52 = vmul.f32 %v671_v46, %v671_v46  ;;  %v675_v56 = vmul.f32 0.03125, %v667_v50  ;;  %vm710_vm4 = vmor %vm708_vm3, %vm709_vm2  ;;  %vm718_vm6 = vweird.f32 %v690_v38 }
 0x60d   :  { %v704_v57 = vmul.f32 %v1461_v45, %v703_v49  ;;  %v701_v58 = vsel %vm700_vm0, %v1459_v26, %v697_v51  ;;  %v1571_v49 = vmov 9  }
 0x60e   :  { %v683_v59 = vsub.f32 %v675_v56, %v679_v52  ;;  %v732_v63 = vmul.f32 %v701_v58, %v1670_v37 }
 0x60f   :  { %v705_v0 = vmul.f32 0.5, %v704_v57 }
 0x610   :  { %v687_v55 = vmax.f32 %v683_v59, 0.0  ;;  %v736_v2 = vmul.f32 %v732_v63, %v668_v9 }
 0x611   :  { %v706_v7 = vsub.f32 1.5, %v705_v0 }
 0x612   :  { %v1463_v8 = vpop.eup %1462  ;;  %v691_v11 = vadd.f32 1e-05, %v687_v55  ;;  %744 = vrot.lane.b32.xlu2 %v736_v2, %s1564_s12 }
 0x613   :  { %v713_v10 = vmul.f32 %v1463_v8, %v690_v38  ;;  %v707_v13 = vmul.f32 %v1461_v45, %v706_v7  ;;  %vm719_vm5 = vweird.f32 %v1463_v8 }
 0x614   :  { %1464 = vrsqrt.f32 %v691_v11  ;;  %vm720_vm7 = vmor %vm718_vm6, %vm719_vm5  ;;  %vm728_vm8 = vweird.f32 %v691_v11 }
 0x615   :  { %v714_v14 = vmul.f32 %v1463_v8, %v713_v10  ;;  %v711_v17 = vsel %vm710_vm4, %v1461_v45, %v707_v13  ;;  %v1570_v45 = vmov 8  }
 0x616   :  { %v733_v18 = vmul.f32 %v711_v17, %v1664_v34 }
 0x617   :  { %v715_v23 = vmul.f32 0.5, %v714_v14 }
 0x618   :  { %v737_v24 = vmul.f32 %v733_v18, %v669_v15 }
 0x619   :  { %v716_v16 = vsub.f32 1.5, %v715_v23 }
 0x61a   :  { %v1465_v9 = vpop.eup %1464  ;;  %746 = vrot.lane.b32.xlu1 %v737_v24, %s1564_s12 }
 0x61b   :  { %v723_v19 = vmul.f32 %v1465_v9, %v691_v11  ;;  %v717_v20 = vmul.f32 %v1463_v8, %v716_v16  ;;  %vm729_vm9 = vweird.f32 %v1465_v9 }
 0x61c   :  { %vm730_vm10 = vmor %vm728_vm8, %vm729_vm9 }
 0x61d   :  { %v724_v21 = vmul.f32 %v1465_v9, %v723_v19  ;;  %v721_v22 = vsel %vm720_vm7, %v1463_v8, %v717_v20 }
 0x61e   :  { %v734_v25 = vmul.f32 %v721_v22, %v1682_v40 }
 0x61f   :  { %v725_v26 = vmul.f32 0.5, %v724_v21 }
 0x620   :  { %v738_v27 = vmul.f32 %v734_v25, %v1833_v29 }
 0x621   :  { %v726_v30 = vsub.f32 1.5, %v725_v26 }
 0x622   :  { %748 = vrot.lane.b32.xlu0 %v738_v27, %s1564_s12 }
 0x623   :  { %v727_v15 = vmul.f32 %v1465_v9, %v726_v30 }
 0x625   :  { %v731_v31 = vsel %vm730_vm10, %v1465_v9, %v727_v15  ;;  %v1179_v9 = vlaneseq  ;;  %vm1216_vm10 = vcmask 392512  }
 0x626   :  { %v735_v32 = vmul.f32 %v731_v31, %v1676_v39 }
 0x627   :  { %v1902_v21 = vand.u32 127, %v1179_v9 }
 0x628   :  { %v739_v33 = vmul.f32 %v735_v32, %v671_v46 }
 0x629   :  { %v1182_v3 = vadd.s32 4294967288, %v1902_v21  ;;  %v1909_v15 = vadd.s32 4294967280, %v1902_v21 }
 0x62a   :  { %762 = vperm.xlu0 %1431, %v732_v63   ;;  %750 = vrot.lane.b32.xlu2 %v739_v33, %s1564_s12 }
 0x632   :  { %767 = vperm.xlu2 %1432, %v733_v18   ;;  %1434 = vset.pattern.permute.xlu0 %v1569_v35 }
 0x63a   :  { %772 = vperm.xlu2 %1432, %v734_v25  }
 0x642   :  { %1436 = vset.pattern.permute.xlu2 %v1569_v35 }
 0x66c   :  { %v745_v36 = vpop.permute.xlu2 %744 }
 0x66d   :  { %v756_v29 = vsub.f32 %v1670_v37, %v745_v36 }
 0x66f   :  { %786 = vperm.xlu1 %1433, %v756_v29  }
 0x684   :  { %v751_v41 = vpop.permute.xlu2 %750 }
 0x685   :  { %v759_v42 = vsub.f32 %v1676_v39, %v751_v41 }
 0x687   :  { %801 = vperm.xlu2 %1436, %v759_v42  }
 0x68c   :  { %v747_v43 = vpop.permute.xlu1 %746  ;;  %v768_v55 = vpop.permute.xlu2 %767 }
 0x68d   :  { %v757_v44 = vsub.f32 %v1664_v34, %v747_v43  ;;  %v781_v2 = vmul.f32 %v768_v55, %v641_v54  ;;  %v109_v55 = vld [vmem:[%s2163_s5 + $0x80] sm:$0xff] }
 0x68f   :  { %1438 = vset.pattern.permute.xlu2 %v1570_v45  ;;  %791 = vperm.xlu1 %1433, %v757_v44  }
 0x690   :  { %870 = vperm.xlu2 %1438, %v1682_v40  }
 0x694   :  { %v749_v38 = vpop.permute.xlu0 %748 }
 0x695   :  { %v758_v46 = vsub.f32 %v1682_v40, %v749_v38  ;;  %v105_v38 = vld [vmem:[%s2163_s5 + $0x60] sm:$0xff] }
 0x697   :  { %796 = vperm.xlu0 %1434, %v758_v46   ;;  %1435 = vset.pattern.permute.xlu1 %v1568_v28  ;;  %v91_v28 = vld [vmem:[%s2160_s2] sm:$0x3]  ;;  %v106_v46 = vld [vmem:[%s2163_s5 + $0x68] sm:$0xff] }
 0x698   :  { %1440 = vset.pattern.permute.xlu2 %v1571_v49  ;;  %777 = vperm.xlu1 %1435, %v735_v32   ;;  %v1864_v50 = vperm.slane %v91_v28, 0 }
 0x699   :  { %923 = vperm.xlu2 %1440, %v1670_v37  }
 0x69a   :  { %v469_v51 = vadd.f32 %v1864_v50, %v1751_v62  ;;  %v470_v56 = vadd.f32 %v1864_v50, %v1756_v1 }
 0x69c   :  { %v763_v57 = vpop.permute.xlu0 %762 }
 0x69d   :  { %v780_v58 = vmul.f32 %v763_v57, %v640_v48  ;;  %v773_v48 = vpop.permute.xlu2 %772 }
 0x69e   :  { %v782_v11 = vmul.f32 %v773_v48, %v642_v61 }
 0x69f   :  { %1439 = vset.pattern.permute.xlu0 %v1570_v45 }
 0x6a0   :  { %866 = vperm.xlu0 %1439, %v1664_v34   ;;  %1437 = vset.pattern.permute.xlu1 %v1570_v45 }
 0x6a1   :  { %931 = vperm.xlu2 %1440, %v1682_v40   ;;  %874 = vperm.xlu1 %1437, %v1676_v39   ;;  %v464_v40 = vrot.slane %v91_v28, 1  ;;  %v108_v28 = vld [vmem:[%s2163_s5 + $0x78] sm:$0xff] }
 0x6a3   :  { %v1868_v52 = vperm.slane %v464_v40, 0 }
 0x6a8   :  { %1442 = vset.pattern.permute.xlu0 %v1571_v49 }
 0x6a9   :  { %935 = vperm.xlu0 %1442, %v1676_v39   ;;  %862 = vperm.xlu1 %1437, %v1670_v37   ;;  %v474_v39 = vadd.f32 %v1868_v52, %v1756_v1  ;;  %v473_v37 = vadd.f32 %v1868_v52, %v1751_v62 }
 0x6b1   :  { %1441 = vset.pattern.permute.xlu1 %v1571_v49  ;;  %v107_v49 = vld [vmem:[%s2163_s5 + $0x70] sm:$0xff] }
 0x6b2   :  { %927 = vperm.xlu1 %1441, %v1664_v34   ;;  %v471_v34 = vadd.f32 %v1864_v50, %v1761_v6 }
 0x6ca   :  { %477 = vmax.xlane.f32.xlu2 %v469_v51 }
 0x6d2   :  { %487 = vmax.xlane.f32.xlu2 %v474_v39 }
 0x6d3   :  { %485 = vmax.xlane.f32.xlu0 %v473_v37 }
 0x6db   :  { %481 = vmax.xlane.f32.xlu0 %v471_v34 }
 0x6dc   :  { %479 = vmax.xlane.f32.xlu1 %v470_v56 }
 0x6e1   :  { %v787_v59 = vpop.permute.xlu1 %786  ;;  %v802_v54 = vpop.permute.xlu2 %801 }
 0x6e2   :  { %v804_v63 = vadd.f32 %v787_v59, %v780_v58 }
 0x6e4   :  { %848 = vmatmul.f32.vlgmr.msrb.gmra.mxu3 %v804_v63  ;;  %v812_v0 = vadd.f32 %v804_v63, %v1868_v52  ;;  %v808_v62 = vadd.f32 %v804_v63, %v1864_v50 }
 0x6e6   :  { %824 = vmax.xlane.f32.xlu2 %v812_v0  ;;  %816 = vmax.xlane.f32.xlu1 %v808_v62 }
 0x6ea   :  { %v871_v18 = vpop.permute.xlu2 %870 }
 0x6f3   :  { %v1896_v23 = vpop.permute.xlu2 %923 }
 0x6fb   :  { %v1898_v61 = vpop.permute.xlu2 %931 }
 0x701   :  { %v792_v1 = vpop.permute.xlu1 %791 }
 0x702   :  { %v805_v7 = vadd.f32 %v792_v1, %v781_v2  ;;  %v110_v2 = vld [vmem:[%s2163_s5 + $0x88] sm:$0xff]  ;;  %v111_v1 = vld [vmem:[%s2163_s5 + $0x90] sm:$0xff] }
 0x704   :  { %851 = vmatmul.f32.gmra.mxu3 %v805_v7  ;;  %v813_v8 = vadd.f32 %v805_v7, %v1868_v52  ;;  %v809_v47 = vadd.f32 %v805_v7, %v1864_v50  ;;  %v112_v7 = vld [vmem:[%s2163_s5 + $0x98] sm:$0xff] }
 0x706   :  { %826 = vmax.xlane.f32.xlu1 %v813_v8  ;;  %818 = vmax.xlane.f32.xlu0 %v809_v47 }
 0x709   :  { %v797_v10 = vpop.permute.xlu0 %796 }
 0x70a   :  { %v1888_v13 = vadd.f32 %v797_v10, %v782_v11  ;;  %v778_v14 = vpop.permute.xlu1 %777 }
 0x70b   :  { %v783_v53 = vmul.f32 %v778_v14, %v643_v4 }
 0x70c   :  { %854 = vmatmul.f32.gmra.mxu3 %v1888_v13 }
 0x70d   :  { %v1893_v17 = vadd.f32 %v802_v54, %v783_v53 }
 0x712   :  { %v867_v60 = vpop.permute.xlu0 %866 }
 0x713   :  { %v875_v24 = vpop.permute.xlu1 %874 }
 0x714   :  { %857 = vmatmul.f32.gmra.mxu3 %v1893_v17 }
 0x71b   :  { %v863_v16 = vpop.permute.xlu1 %862  ;;  %v1900_v19 = vpop.permute.xlu0 %935 }
 0x724   :  { %v928_v22 = vpop.permute.xlu1 %927 }
 0x73d   :  { %v478_v20 = vpop.xlane.xlu2 %477 }
 0x73e   :  { %v1181_v33 = vperm.slane %v478_v20, %v1902_v21 }
 0x745   :  { %v488_v4 = vpop.xlane.xlu2 %487 }
 0x746   :  { %v1195_v25 = vperm.slane %v488_v4, %v1182_v3  ;;  %v486_v26 = vpop.xlane.xlu0 %485 }
 0x747   :  { %v1194_v27 = vperm.slane %v486_v26, %v1902_v21 }
 0x749   :  { %v1906_v30 = vsel %vm1184_vm11, %v1195_v25, %v1194_v27 }
 0x74e   :  { %v482_v31 = vpop.xlane.xlu0 %481 }
 0x74f   :  { %v480_v32 = vpop.xlane.xlu1 %479  ;;  %v1187_v36 = vperm.slane %v482_v31, %v1909_v15 }
 0x750   :  { %v1183_v35 = vperm.slane %v480_v32, %v1182_v3 }
 0x752   :  { %v1185_v29 = vsel %vm1184_vm11, %v1183_v35, %v1181_v33  ;;  %vm1220_vm11 = vcmask 458112  }
 0x753   :  { %v1914_v41 = vsel %vm1188_vm12, %v1187_v36, %v1185_v29 }
 0x759   :  { %v1981_v31 = vpop.xlane.xlu2 %824 }
 0x767   :  { %v849_v42 = vpop.f32.mrf.mxu3 }
 0x787   :  { %v852_v43 = vpop.f32.mrf.mxu3 }
 0x78f   :  { %v855_v44 = vpop.f32.mrf.mxu3 }
 0x797   :  { %v858_v45 = vpop.f32.mrf.mxu3 }
 0x798   :  { %901 = vmatpush.msra.mxu2 %v858_v45 }
 0x79a   :  { %902 = vmatpush.msra.mxu2 %v855_v44  ;;  %v1983_v44 = vpop.xlane.xlu0 %818 }
 0x79c   :  { %903 = vmatpush.msra.mxu2 %v852_v43 }
 0x79e   :  { %904 = vmatpush.msra.mxu2 %v849_v42 }
 0x79f   :  { %1386 = vmatmul.msk.f32.vlgmr.msra.gmra.mxu2 %vm250_vm1, %v105_v38 }
 0x7a7   :  { %1387 = vmatmul.msk.f32.gmra.mxu2 %vm250_vm1, %v106_v46 }
 0x7af   :  { %1388 = vmatmul.msk.f32.gmra.mxu2 %vm250_vm1, %v107_v49 }
 0x7b7   :  { %1389 = vmatmul.msk.f32.gmra.mxu2 %vm250_vm1, %v108_v28 }
 0x822   :  { %v906_v51 = vpop.f32.mrf.mxu2 }
 0x823   :  { %v907_v59 = vadd.f32 %v906_v51, %v863_v16 }
 0x825   :  { %v918_v62 = vmax.f32 %v907_v59, 0.0 }
 0x82a   :  { %v909_v40 = vpop.f32.mrf.mxu2 }
 0x82b   :  { %v910_v57 = vadd.f32 %v909_v40, %v867_v60 }
 0x82d   :  { %v919_v0 = vmax.f32 %v910_v57, 0.0 }
 0x832   :  { %v912_v39 = vpop.f32.mrf.mxu2 }
 0x833   :  { %v913_v34 = vadd.f32 %v912_v39, %v871_v18 }
 0x835   :  { %v920_v63 = vmax.f32 %v913_v34, 0.0 }
 0x83a   :  { %v915_v37 = vpop.f32.mrf.mxu2 }
 0x83b   :  { %v916_v56 = vadd.f32 %v915_v37, %v875_v24 }
 0x83d   :  { %v921_v58 = vmax.f32 %v916_v56, 0.0 }
 0x83f   :  { %962 = vmatpush.msra.mxu1 %v921_v58 }
 0x841   :  { %963 = vmatpush.msra.mxu1 %v920_v63 }
 0x843   :  { %964 = vmatpush.msra.mxu1 %v919_v0 }
 0x845   :  { %965 = vmatpush.msra.mxu1 %v918_v62 }
 0x846   :  { %1390 = vmatmul.msk.f32.vlgmr.msra.gmra.mxu1 %vm250_vm1, %v109_v55 }
 0x84e   :  { %1391 = vmatmul.msk.f32.gmra.mxu1 %vm250_vm1, %v110_v2 }
 0x856   :  { %1392 = vmatmul.msk.f32.gmra.mxu1 %vm250_vm1, %v111_v1 }
 0x85e   :  { %1393 = vmatmul.msk.f32.gmra.mxu1 %vm250_vm1, %v112_v7 }
 0x8c3   :  { %v967_v8 = vpop.f32.mrf.mxu1 }
 0x8c4   :  { %v1949_v47 = vadd.f32 %v967_v8, %v1896_v23 }
 0x8c6   :  { %v979_v48 = vmax.f32 %v1949_v47, 0.0 }
 0x8c8   :  { %v983_v11 = vmul.f32 %v1710_v5, %v979_v48 }
 0x8ca   :  { %991 = vadd.xlane.f32.xlu1 %v983_v11  ;;  %v987_v10 = vmul.f32 %v983_v11, %v983_v11 }
 0x8cb   :  { %v970_v14 = vpop.f32.mrf.mxu1 }
 0x8cc   :  { %v1955_v53 = vadd.f32 %v970_v14, %v928_v22  ;;  %999 = vadd.xlane.f32.xlu2 %v987_v10 }
 0x8ce   :  { %v980_v54 = vmax.f32 %v1955_v53, 0.0 }
 0x8d0   :  { %v984_v18 = vmul.f32 %v1710_v5, %v980_v54 }
 0x8d2   :  { %v988_v23 = vmul.f32 %v984_v18, %v984_v18 }
 0x8d3   :  { %v973_v24 = vpop.f32.mrf.mxu1 }
 0x8d4   :  { %v1962_v60 = vadd.f32 %v973_v24, %v1898_v61  ;;  %993 = vadd.xlane.f32.xlu2 %v984_v18  ;;  %1001 = vadd.xlane.f32.xlu1 %v988_v23  ;;  %v1474_v61 = vld [vmem:[%s2161_s3] ss:$0 sm:$0xff] }
 0x8d6   :  { %v981_v16 = vmax.f32 %v1962_v60, 0.0 }
 0x8d8   :  { %v985_v9 = vmul.f32 %v1710_v5, %v981_v16  ;;  %v1977_v5 = vpop.xlane.xlu1 %816 }
 0x8da   :  { %995 = vadd.xlane.f32.xlu0 %v985_v9  ;;  %v989_v20 = vmul.f32 %v985_v9, %v985_v9 }
 0x8db   :  { %v976_v3 = vpop.f32.mrf.mxu1 }
 0x8dc   :  { %v1969_v4 = vadd.f32 %v976_v3, %v1900_v19  ;;  %1003 = vadd.xlane.f32.xlu2 %v989_v20  ;;  %v1572_v19 = vmov 10  }
 0x8dd   :  { %1443 = vset.pattern.permute.xlu0 %v1572_v19  ;;  %1445 = vset.pattern.permute.xlu1 %v1572_v19 }
 0x8de   :  { %v982_v22 = vmax.f32 %v1969_v4, 0.0  ;;  %1444 = vset.pattern.permute.xlu2 %v1572_v19  ;;  %v1222_v4 = vadd.s32 4294967240, %v1902_v21 }
 0x8e0   :  { %v986_v25 = vmul.f32 %v1474_v61, %v982_v22  ;;  %v1979_v27 = vpop.xlane.xlu1 %826 }
 0x8e2   :  { %997 = vadd.xlane.f32.xlu1 %v986_v25  ;;  %v990_v26 = vmul.f32 %v986_v25, %v986_v25  ;;  %v1992_v25 = vld [vmem:[%s2164_s6] sm:$0xff] }
 0x8e4   :  { %1005 = vadd.xlane.f32.xlu0 %v990_v26 }
 0x93d   :  { %v992_v32 = vpop.xlane.xlu1 %991 }
 0x93e   :  { %v1007_v33 = vmul.f32 0.03125, %v992_v32 }
 0x93f   :  { %v1000_v35 = vpop.xlane.xlu2 %999 }
 0x940   :  { %v1015_v36 = vmul.f32 %v1007_v33, %v1007_v33  ;;  %v1011_v29 = vmul.f32 0.03125, %v1000_v35 }
 0x942   :  { %v1019_v42 = vsub.f32 %v1011_v29, %v1015_v36 }
 0x944   :  { %v1023_v43 = vmax.f32 %v1019_v42, 0.0 }
 0x946   :  { %v1027_v45 = vadd.f32 1e-05, %v1023_v43 }
 0x947   :  { %v994_v38 = vpop.xlane.xlu2 %993  ;;  %v1002_v46 = vpop.xlane.xlu1 %1001 }
 0x948   :  { %1466 = vrsqrt.f32 %v1027_v45  ;;  %v1008_v49 = vmul.f32 0.03125, %v994_v38  ;;  %v1012_v51 = vmul.f32 0.03125, %v1002_v46  ;;  %vm1037_vm14 = vweird.f32 %v1027_v45 }
 0x94a   :  { %v1016_v28 = vmul.f32 %v1008_v49, %v1008_v49 }
 0x94c   :  { %v1020_v40 = vsub.f32 %v1012_v51, %v1016_v28 }
 0x94d   :  { %v996_v39 = vpop.xlane.xlu0 %995 }
 0x94e   :  { %v1467_v37 = vpop.eup %1466  ;;  %v1024_v34 = vmax.f32 %v1020_v40, 0.0  ;;  %v1985_v56 = vmul.f32 0.03125, %v996_v39  ;;  %v1476_v40 = vld [vmem:[%s2164_s6 + $0x8] sm:$0xff] }
 0x94f   :  { %v1032_v57 = vmul.f32 %v1467_v37, %v1027_v45  ;;  %v1004_v58 = vpop.xlane.xlu2 %1003  ;;  %vm1038_vm13 = vweird.f32 %v1467_v37 }
 0x950   :  { %v1028_v59 = vadd.f32 1e-05, %v1024_v34  ;;  %v1017_v63 = vmul.f32 %v1985_v56, %v1985_v56  ;;  %v1013_v0 = vmul.f32 0.03125, %v1004_v58  ;;  %vm1039_vm15 = vmor %vm1037_vm14, %vm1038_vm13  ;;  %vm1201_vm13 = vcmask 1041409  }
 0x951   :  { %v1033_v62 = vmul.f32 %v1467_v37, %v1032_v57  ;;  %vm1224_vm14 = vcmask 523712  }
 0x952   :  { %1468 = vrsqrt.f32 %v1028_v59  ;;  %v1021_v55 = vsub.f32 %v1013_v0, %v1017_v63  ;;  %vm1047_vm2 = vweird.f32 %v1028_v59  ;;  %v1477_v0 = vld [vmem:[%s2164_s6 + $0x10] sm:$0xff] }
 0x953   :  { %v1034_v2 = vmul.f32 0.5, %v1033_v62 }
 0x954   :  { %v1025_v1 = vmax.f32 %v1021_v55, 0.0 }
 0x955   :  { %v1035_v7 = vsub.f32 1.5, %v1034_v2  ;;  %v998_v8 = vpop.xlane.xlu1 %997 }
 0x956   :  { %v1029_v11 = vadd.f32 1e-05, %v1025_v1  ;;  %v1010_v10 = vmul.f32 0.03125, %v998_v8  ;;  %v1478_v8 = vld [vmem:[%s2164_s6 + $0x18] sm:$0xff] }
 0x957   :  { %v1006_v14 = vpop.xlane.xlu0 %1005  ;;  %v1036_v18 = vmul.f32 %v1467_v37, %v1035_v7 }
 0x958   :  { %v1469_v23 = vpop.eup %1468  ;;  %1470 = vrsqrt.f32 %v1029_v11  ;;  %v1018_v24 = vmul.f32 %v1010_v10, %v1010_v10  ;;  %v1014_v9 = vmul.f32 0.03125, %v1006_v14  ;;  %vm1057_vm5 = vweird.f32 %v1029_v11 }
 0x959   :  { %v1042_v20 = vmul.f32 %v1469_v23, %v1028_v59  ;;  %v1040_v3 = vsel %vm1039_vm15, %v1467_v37, %v1036_v18  ;;  %vm1048_vm0 = vweird.f32 %v1469_v23  ;;  %v475_v18 = vadd.f32 %v1868_v52, %v1761_v6 }
 0x95a   :  { %v1022_v61 = vsub.f32 %v1014_v9, %v1018_v24  ;;  %v1071_v26 = vmul.f32 %v1992_v25, %v1040_v3  ;;  %vm1049_vm3 = vmor %vm1047_vm2, %vm1048_vm0  ;;  %v1573_v24 = vmov 11   ;;  %vm1251_vm15 = vcmask 720512  }
 0x95b   :  { %v1043_v19 = vmul.f32 %v1469_v23, %v1042_v20  ;;  %vm1255_vm0 = vcmask 786112   ;;  %vm1267_vm2 = vcmask 523264  }
 0x95c   :  { %v1026_v32 = vmax.f32 %v1022_v61, 0.0  ;;  %1101 = vperm.xlu0 %1443, %v1071_v26   ;;  %v1075_v35 = vmul.f32 %v1071_v26, %v1007_v33 }
 0x95d   :  { %v1044_v36 = vmul.f32 0.5, %v1043_v19 }
 0x95e   :  { %v1471_v29 = vpop.eup %1470  ;;  %v1030_v42 = vadd.f32 1e-05, %v1026_v32  ;;  %1083 = vrot.lane.b32.xlu1 %v1075_v35, %s1564_s12  ;;  %v476_v35 = vadd.f32 %v1868_v52, %v1766_v12 }
 0x95f   :  { %v1045_v43 = vsub.f32 1.5, %v1044_v36  ;;  %v1052_v45 = vmul.f32 %v1471_v29, %v1029_v11  ;;  %vm1058_vm4 = vweird.f32 %v1471_v29 }
 0x960   :  { %1472 = vrsqrt.f32 %v1030_v42  ;;  %vm1059_vm6 = vmor %vm1057_vm5, %vm1058_vm4  ;;  %vm1067_vm8 = vweird.f32 %v1030_v42  ;;  %vm1348_vm4 = vcmask 1041408  }
 0x961   :  { %v1053_v38 = vmul.f32 %v1471_v29, %v1052_v45  ;;  %v1046_v46 = vmul.f32 %v1469_v23, %v1045_v43  ;;  %v2024_v43 = vadd.s32 4294967256, %v1902_v21  ;;  %v2027_v45 = vadd.s32 4294967264, %v1902_v21 }
 0x963   :  { %v1054_v28 = vmul.f32 0.5, %v1053_v38  ;;  %v1050_v51 = vsel %vm1049_vm3, %v1469_v23, %v1046_v46  ;;  %v810_v23 = vadd.f32 %v1888_v13, %v1864_v50  ;;  %v1215_v38 = vperm.slane %v1983_v44, %v2024_v43 }
 0x964   :  { %v1072_v33 = vmul.f32 %v1476_v40, %v1050_v51  ;;  %1447 = vset.pattern.permute.xlu0 %v1573_v24  ;;  %v2032_v46 = vadd.s32 4294967248, %v1902_v21  ;;  %v815_v44 = vadd.f32 %v1893_v17, %v1868_v52  ;;  %vm1299_vm3 = vcmask 785408  }
 0x965   :  { %v1055_v39 = vsub.f32 1.5, %v1054_v28  ;;  %v472_v28 = vadd.f32 %v1864_v50, %v1766_v12 }
 0x966   :  { %v1473_v37 = vpop.eup %1472  ;;  %v1076_v34 = vmul.f32 %v1072_v33, %v1008_v49 }
 0x967   :  { %v1062_v57 = vmul.f32 %v1473_v37, %v1030_v42  ;;  %v1056_v58 = vmul.f32 %v1471_v29, %v1055_v39  ;;  %vm1068_vm7 = vweird.f32 %v1473_v37 }
 0x968   :  { %1085 = vrot.lane.b32.xlu2 %v1076_v34, %s1564_s12  ;;  %vm1069_vm9 = vmor %vm1067_vm8, %vm1068_vm7 }
 0x969   :  { %v1063_v59 = vmul.f32 %v1473_v37, %v1062_v57  ;;  %v1060_v63 = vsel %vm1059_vm6, %v1471_v29, %v1056_v58 }
 0x96a   :  { %v1073_v62 = vmul.f32 %v1477_v0, %v1060_v63 }
 0x96b   :  { %v1064_v55 = vmul.f32 0.5, %v1063_v59 }
 0x96c   :  { %1111 = vperm.xlu1 %1445, %v1073_v62   ;;  %v1077_v2 = vmul.f32 %v1073_v62, %v1985_v56  ;;  %v814_v56 = vadd.f32 %v1888_v13, %v1868_v52 }
 0x96d   :  { %v1065_v1 = vsub.f32 1.5, %v1064_v55 }
 0x96e   :  { %1087 = vrot.lane.b32.xlu0 %v1077_v2, %s1564_s12 }
 0x96f   :  { %v1066_v49 = vmul.f32 %v1473_v37, %v1065_v1 }
 0x971   :  { %v1070_v7 = vsel %vm1069_vm9, %v1473_v37, %v1066_v49 }
 0x972   :  { %v1074_v11 = vmul.f32 %v1478_v8, %v1070_v7 }
 0x974   :  { %v1078_v14 = vmul.f32 %v1074_v11, %v1010_v10  ;;  %1446 = vset.pattern.permute.xlu1 %v1573_v24 }
 0x976   :  { %1089 = vrot.lane.b32.xlu1 %v1078_v14, %s1564_s12 }
 0x991   :  { %489 = vmax.xlane.f32.xlu2 %v475_v18 }
 0x998   :  { %828 = vmax.xlane.f32.xlu0 %v814_v56 }
 0x9a0   :  { %820 = vmax.xlane.f32.xlu1 %v810_v23 }
 0x9a9   :  { %1106 = vperm.xlu2 %1444, %v1072_v33  }
 0x9b1   :  { %1116 = vperm.xlu2 %1444, %v1074_v11  }
 0x9b9   :  { %1448 = vset.pattern.permute.xlu2 %v1573_v24 }
 0x9c2   :  { %v1086_v10 = vpop.permute.xlu2 %1085 }
 0x9c3   :  { %v1096_v9 = vsub.f32 %v1476_v40, %v1086_v10 }
 0x9c5   :  { %1130 = vperm.xlu0 %1447, %v1096_v9   ;;  %v1226_v9 = vperm.slane %v1981_v31, %v2027_v45  ;;  %v1292_v31 = vld [vmem:[%s2165_s7 + $0xb8] sm:$0xff] }
 0x9c6   :  { %1327 = vmatpush.msrb.mxu2 %v1292_v31 }
 0x9ce   :  { %v1102_v3 = vpop.permute.xlu0 %1101 }
 0x9cf   :  { %v1119_v59 = vmul.f32 %v1102_v3, %v979_v48 }
 0x9d0   :  { %v1084_v20 = vpop.permute.xlu1 %1083 }
 0x9d1   :  { %v1095_v6 = vsub.f32 %v1992_v25, %v1084_v20  ;;  %v811_v25 = vadd.f32 %v1893_v17, %v1864_v50 }
 0x9d3   :  { %1125 = vperm.xlu1 %1446, %v1095_v6  }
 0x9de   :  { %v1112_v61 = vpop.permute.xlu1 %1111 }
 0x9df   :  { %v1121_v53 = vmul.f32 %v1112_v61, %v981_v16 }
 0x9e0   :  { %v1088_v26 = vpop.permute.xlu0 %1087 }
 0x9e1   :  { %v1097_v19 = vsub.f32 %v1477_v0, %v1088_v26 }
 0x9e3   :  { %1135 = vperm.xlu2 %1448, %v1097_v19  }
 0x9e8   :  { %v1090_v13 = vpop.permute.xlu1 %1089 }
 0x9e9   :  { %v1098_v32 = vsub.f32 %v1478_v8, %v1090_v13  ;;  %v1190_v8 = vadd.s32 4294967272, %v1902_v21 }
 0x9eb   :  { %1140 = vperm.xlu1 %1446, %v1098_v32  }
 0x9ef   :  { %491 = vmax.xlane.f32.xlu0 %v476_v35  ;;  %v1289_v35 = vld [vmem:[%s2165_s7 + $0xa0] sm:$0xff] }
 0xa04   :  { %v490_v36 = vpop.xlane.xlu2 %489 }
 0xa05   :  { %v1197_v29 = vperm.slane %v490_v36, %v1909_v15  ;;  %v1290_v36 = vld [vmem:[%s2165_s7 + $0xa8] sm:$0xff] }
 0xa06   :  { %1328 = vmatpush.msrb.mxu2 %v1290_v36 }
 0xa07   :  { %v1198_v42 = vsel %vm1188_vm12, %v1197_v29, %v1906_v30  ;;  %v1213_v30 = vperm.slane %v1977_v5, %v2027_v45  ;;  %vm1192_vm12 = vcmask 261312   ;;  %v1287_v29 = vld [vmem:[%s2165_s7 + $0x90] sm:$0xff] }
 0xa08   :  { %v1283_v45 = vld [vmem:[%s2165_s7 + $0x70] sm:$0xff] }
 0xa09   :  { %v1217_v40 = vsel %vm1216_vm10, %v1215_v38, %v1213_v30  ;;  %v1284_v38 = vld [vmem:[%s2165_s7 + $0x78] sm:$0xff]  ;;  %v1282_v30 = vld [vmem:[%s2165_s7 + $0x68] sm:$0xff] }
 0xa0b   :  { %v829_v39 = vpop.xlane.xlu0 %828 }
 0xa0c   :  { %822 = vmax.xlane.f32.xlu2 %v811_v25  ;;  %v1107_v37 = vpop.permute.xlu2 %1106  ;;  %v1229_v10 = vperm.slane %v829_v39, %v2032_v46  ;;  %v1285_v25 = vld [vmem:[%s2165_s7 + $0x80] sm:$0xff] }
 0xa0d   :  { %v1120_v5 = vmul.f32 %v1107_v37, %v980_v54  ;;  %v1273_v39 = vld [vmem:[%s2165_s7 + $0x20] sm:$0xff]  ;;  %v1274_v37 = vld [vmem:[%s2165_s7 + $0x28] sm:$0xff] }
 0xa13   :  { %v821_v15 = vpop.xlane.xlu1 %820 }
 0xa14   :  { %v1219_v51 = vperm.slane %v821_v15, %v2032_v46  ;;  %v1117_v58 = vpop.permute.xlu2 %1116  ;;  %v1281_v46 = vld [vmem:[%s2165_s7 + $0x60] sm:$0xff]  ;;  %v1279_v15 = vld [vmem:[%s2165_s7 + $0x50] sm:$0xff] }
 0xa15   :  { %483 = vmax.xlane.f32.xlu1 %v472_v28  ;;  %v1122_v48 = vmul.f32 %v1117_v58, %v982_v22  ;;  %v1280_v28 = vld [vmem:[%s2165_s7 + $0x58] sm:$0xff] }
 0xa16   :  { %v1221_v33 = vsel %vm1220_vm11, %v1219_v51, %v1217_v40  ;;  %v1277_v51 = vld [vmem:[%s2165_s7 + $0x40] sm:$0xff]  ;;  %v1278_v40 = vld [vmem:[%s2165_s7 + $0x48] sm:$0xff] }
 0xa1d   :  { %830 = vmax.xlane.f32.xlu1 %v815_v44  ;;  %v1276_v44 = vld [vmem:[%s2165_s7 + $0x38] sm:$0xff] }
 0xa37   :  { %v1131_v34 = vpop.permute.xlu0 %1130 }
 0xa38   :  { %v1144_v57 = vadd.f32 %v1131_v34, %v1120_v5  ;;  %v1271_v5 = vld [vmem:[%s2165_s7 + $0x10] sm:$0xff]  ;;  %v1272_v34 = vld [vmem:[%s2165_s7 + $0x18] sm:$0xff] }
 0xa3a   :  { %v1148_v12 = vadd.f32 %v1144_v57, %v1864_v50  ;;  %v1152_v1 = vadd.f32 %v1144_v57, %v1868_v52  ;;  %v1269_v57 = vld [vmem:[%s2165_s7] sm:$0xff] }
 0xa3c   :  { %1157 = vmax.xlane.f32.xlu1 %v1148_v12  ;;  %v1270_v12 = vld [vmem:[%s2165_s7 + $0x8] sm:$0xff] }
 0xa3d   :  { %v1136_v55 = vpop.permute.xlu2 %1135 }
 0xa3e   :  { %v1145_v54 = vadd.f32 %v1136_v55, %v1121_v53  ;;  %v1249_v55 = vadd.s32 4294967216, %v1902_v21  ;;  %v1245_v53 = vadd.s32 4294967224, %v1902_v21 }
 0xa40   :  { %v1149_v2 = vadd.f32 %v1145_v54, %v1864_v50  ;;  %v1153_v47 = vadd.f32 %v1145_v54, %v1868_v52 }
 0xa45   :  { %v1126_v63 = vpop.permute.xlu1 %1125 }
 0xa46   :  { %v1143_v0 = vadd.f32 %v1126_v63, %v1119_v59 }
 0xa48   :  { %v1151_v62 = vadd.f32 %v1143_v0, %v1868_v52  ;;  %v1147_v17 = vadd.f32 %v1143_v0, %v1864_v50 }
 0xa4a   :  { %1163 = vmax.xlane.f32.xlu0 %v1151_v62  ;;  %1155 = vmax.xlane.f32.xlu2 %v1147_v17  ;;  %v1243_v17 = vadd.s32 4294967232, %v1902_v21 }
 0xa52   :  { %1159 = vmax.xlane.f32.xlu0 %v1149_v2  ;;  %1165 = vmax.xlane.f32.xlu2 %v1152_v1 }
 0xa5a   :  { %1167 = vmax.xlane.f32.xlu2 %v1153_v47  ;;  %v1253_v47 = vadd.s32 4294967208, %v1902_v21 }
 0xa5d   :  { %v1141_v49 = vpop.permute.xlu1 %1140 }
 0xa5e   :  { %v1146_v7 = vadd.f32 %v1141_v49, %v1122_v48 }
 0xa60   :  { %v1154_v60 = vadd.f32 %v1146_v7, %v1868_v52  ;;  %v1150_v16 = vadd.f32 %v1146_v7, %v1864_v50  ;;  %v1227_v50 = vperm.slane %v1979_v27, %v2024_v43  ;;  %v1291_v27 = vld [vmem:[%s2165_s7 + $0xb0] sm:$0xff]  ;;  %v1286_v43 = vld [vmem:[%s2165_s7 + $0x88] sm:$0xff] }
 0xa61   :  { %1307 = vmatpush.msra.mxu3 %v1291_v27 }
 0xa62   :  { %1169 = vmax.xlane.f32.xlu0 %v1154_v60  ;;  %1161 = vmax.xlane.f32.xlu1 %v1150_v16  ;;  %v492_v11 = vpop.xlane.xlu0 %491  ;;  %v1228_v3 = vsel %vm1216_vm10, %v1227_v50, %v1226_v9  ;;  %v1293_v50 = vld [vmem:[%s2166_s8] sm:$0x3] }
 0xa63   :  { %v1199_v14 = vperm.slane %v492_v11, %v1190_v8  ;;  %v1230_v26 = vsel %vm1220_vm11, %v1229_v10, %v1228_v3  ;;  %1308 = vmatpush.msra.mxu3 %v1289_v35  ;;  %v1295_v10 = vperm.slane %v1293_v50, 0  ;;  %v1296_v9 = vperm.slane %v1293_v50, 1 }
 0xa65   :  { %v1200_v23 = vsel %vm1192_vm12, %v1199_v14, %v1198_v42  ;;  %v1288_v42 = vld [vmem:[%s2165_s7 + $0x98] sm:$0xff]  ;;  %1309 = vmatpush.msra.mxu3 %v1287_v29 }
 0xa66   :  { %1329 = vmatpush.msrb.mxu2 %v1288_v42 }
 0xa67   :  { %1310 = vmatpush.msra.mxu3 %v1285_v25 }
 0xa68   :  { %1330 = vmatpush.msrb.mxu2 %v1286_v43 }
 0xa69   :  { %1311 = vmatpush.msra.mxu3 %v1283_v45 }
 0xa6a   :  { %1331 = vmatpush.msrb.mxu2 %v1284_v38 }
 0xa6b   :  { %1312 = vmatpush.msra.mxu3 %v1281_v46 }
 0xa6c   :  { %1332 = vmatpush.msrb.mxu2 %v1282_v30 }
 0xa6d   :  { %1313 = vmatpush.msra.mxu3 %v1279_v15 }
 0xa6e   :  { %1333 = vmatpush.msrb.mxu2 %v1280_v28 }
 0xa6f   :  { %1314 = vmatpush.msra.mxu3 %v1277_v51 }
 0xa70   :  { %1334 = vmatpush.msrb.mxu2 %v1278_v40 }
 0xa72   :  { %1335 = vmatpush.msrb.mxu2 %v1276_v44 }
 0xa74   :  { %1336 = vmatpush.msrb.mxu2 %v1274_v37 }
 0xa76   :  { %1337 = vmatpush.msrb.mxu2 %v1272_v34 }
 0xa78   :  { %1338 = vmatpush.msrb.mxu2 %v1270_v12 }
 0xa7f   :  { %v823_v24 = vpop.xlane.xlu2 %822 }
 0xa80   :  { %v1223_v20 = vperm.slane %v823_v24, %v1222_v4 }
 0xa88   :  { %v484_v18 = vpop.xlane.xlu1 %483 }
 0xa89   :  { %v1191_v56 = vperm.slane %v484_v18, %v1190_v8 }
 0xa8b   :  { %v1193_v22 = vsel %vm1192_vm12, %v1191_v56, %v1914_v41  ;;  %v1225_v41 = vsel %vm1224_vm14, %v1223_v20, %v1221_v33  ;;  %v1275_v33 = vld [vmem:[%s2165_s7 + $0x30] sm:$0xff] }
 0xa8c   :  { %v1202_v52 = vsel %vm1201_vm13, %v1200_v23, %v1193_v22  ;;  %1315 = vmatpush.msra.mxu3 %v1275_v33 }
 0xa8e   :  { %1316 = vmatpush.msra.mxu3 %v1273_v39 }
 0xa90   :  { %v831_v6 = vpop.xlane.xlu1 %830  ;;  %1317 = vmatpush.msra.mxu3 %v1271_v5 }
 0xa91   :  { %v1231_v61 = vperm.slane %v831_v6, %v1222_v4 }
 0xa92   :  { %1318 = vmatpush.msra.mxu3 %v1269_v57 }
 0xa93   :  { %v1232_v19 = vsel %vm1224_vm14, %v1231_v61, %v1230_v26 }
 0xa94   :  { %v1233_v13 = vsel %vm1201_vm13, %v1232_v19, %v1225_v41 }
 0xa95   :  { %v2072_v32 = vsel %vm250_vm1, %v1202_v52, %v1233_v13  ;;  %vm1247_vm1 = vcmask 654912  }
 0xaaf   :  { %v1158_v0 = vpop.xlane.xlu1 %1157 }
 0xab0   :  { %v1246_v7 = vperm.slane %v1158_v0, %v1245_v53 }
 0xabd   :  { %v1156_v58 = vpop.xlane.xlu2 %1155  ;;  %v1164_v59 = vpop.xlane.xlu0 %1163 }
 0xabe   :  { %v1244_v2 = vperm.slane %v1156_v58, %v1243_v17  ;;  %v1257_v60 = vperm.slane %v1164_v59, %v1243_v17 }
 0xac0   :  { %v1248_v11 = vsel %vm1247_vm1, %v1246_v7, %v1244_v2 }
 0xac5   :  { %v1166_v63 = vpop.xlane.xlu2 %1165  ;;  %v1160_v62 = vpop.xlane.xlu0 %1159 }
 0xac6   :  { %v1258_v1 = vperm.slane %v1166_v63, %v1245_v53  ;;  %v1250_v48 = vperm.slane %v1160_v62, %v1249_v55 }
 0xac8   :  { %v1259_v14 = vsel %vm1247_vm1, %v1258_v1, %v1257_v60  ;;  %v1252_v23 = vsel %vm1251_vm15, %v1250_v48, %v1248_v11 }
 0xacd   :  { %v1168_v54 = vpop.xlane.xlu2 %1167 }
 0xace   :  { %v1260_v49 = vperm.slane %v1168_v54, %v1249_v55 }
 0xad0   :  { %v1261_v4 = vsel %vm1251_vm15, %v1260_v49, %v1259_v14 }
 0xad5   :  { %v1170_v16 = vpop.xlane.xlu0 %1169  ;;  %v1162_v8 = vpop.xlane.xlu1 %1161 }
 0xad6   :  { %v1262_v18 = vperm.slane %v1170_v16, %v1253_v47  ;;  %v1254_v56 = vperm.slane %v1162_v8, %v1253_v47 }
 0xad8   :  { %v1263_v22 = vsel %vm1255_vm0, %v1262_v18, %v1261_v4  ;;  %v1256_v24 = vsel %vm1255_vm0, %v1254_v56, %v1252_v23 }
 0xad9   :  { %v1264_v21 = vsel %vm1201_vm13, %v1263_v22, %v1256_v24 }
 0xada   :  { %v1268_v52 = vsel %vm1267_vm2, %v2072_v32, %v1264_v21 }
 0xadb   :  { %1394 = vmatmul.msk.f32.vlgmr.msra.gmra.mxu3 %vm1299_vm3, %v1268_v52  ;;  %1395 = vmatmul.msk.f32.vlgmr.msrb.gmra.mxu2 %vm1299_vm3, %v1268_v52 }
 0xb5e   :  { %v1320_v20 = vpop.f32.mrf.mxu3  ;;  %v1340_v6 = vpop.f32.mrf.mxu2 }
 0xb5f   :  { %v1321_v3 = vadd.f32 %v1320_v20, %v1295_v10  ;;  %v1341_v61 = vadd.f32 %v1340_v6, %v1296_v9 }
 0xb61   :  { %v1344_v26 = vmax.f32 %v1341_v61, 0.0  ;;  %v1343_v41 = vmax.f32 %v1321_v3, 0.0 }
 0xb63   :  { %v1347_v19 = vrot.slane %v1344_v26, 6 }
 0xb65   :  { %v1349_v13 = vsel %vm1348_vm4, %v1343_v41, %v1347_v19 }
 0xb66   :  { %1351 = vst [vmem:[#allocation7] sm:$0xf] %v1349_v13 }
 0xb67   :  { %1362 = dma.vmem_to_hbm [thread:$0]  %s1358_s22, 64, %s1360_s25, [#allocation4]  }
 0xb68   :  { %1555 = dma.done.wait [#allocation4], 64  }
 0xb69   :  { %1556 = vsyncadd [#allocation4], 4294967232 }
 0xb6a   :  { %1367 = vsyncpa [#allocation3], 1 }
 0xb6b   :  { %1368 = vsyncpa [#allocation6], 1 }
 0xb6c   :  { %1369 = vsyncpa [#allocation4], 1 }

</bundles_post_ra>
